<compile_context>
chip_gen: v5e
topology: v5e:2x2
jax: 0.10.0
libtpu: 0.0.40
codegen_flags: <defaults>
</compile_context>

<pallas_src>
import functools

import jax
import jax.numpy as jnp
from jax import lax
from jax.experimental import pallas as pl
from jax.experimental.pallas import tpu as pltpu

LANE = 128


def _round_up(x, m):
    return (x + m - 1) // m * m


# ------------------------------------------------------------------ fused kernel
def most_fused_kernel(seq_ref, adj_ref, wgc_ref, bgc_ref,
                      wih1_ref, whh1_ref, b1_ref,
                      w2cat_ref, b2_ref,
                      w0_ref, b0_ref, w1_ref, b1m_ref,
                      w2_ref, b2m_ref, w3_ref, b3_ref,
                      out_ref,
                      gx1_ref, h2seq_ref,
                      *, hidden_dim):
    H = hidden_dim
    N = seq_ref.shape[0]
    f32 = jnp.float32
    bf16 = jnp.bfloat16

    # ---- 1. GCN embedding: x = tanh(adj @ (seq @ Wgc) + bgc)   (bf16 operands, f32 acc)
    xw = jnp.dot(seq_ref[...].astype(bf16), wgc_ref[...].astype(bf16),
                 preferred_element_type=f32)
    agg = jnp.dot(adj_ref[...].astype(bf16), xw.astype(bf16),
                  preferred_element_type=f32)
    x = jnp.tanh(agg + bgc_ref[...])

    # ---- 2. 2-layer LSTM over the node sequence
    # Hoisted layer-1 input projection for ALL timesteps (one batched matmul).
    gx1_ref[...] = jnp.dot(x, wih1_ref[...], preferred_element_type=f32) + b1_ref[...]

    # Hoist loop-invariant weight/bias loads out of the recurrence.
    whh1 = whh1_ref[...]          # [H, 4H]
    w2cat = w2cat_ref[...]        # [[wih2];[whh2]] : [2H, 4H]
    b2 = b2_ref[...]              # [1, 4H]

    # Lane mask selecting the g-gate slot of the [1, 4H] gate vector (hoisted).
    lane = lax.broadcasted_iota(jnp.int32, (1, 4 * H), 1)
    is_g = (lane >= 2 * H) & (lane < 3 * H)

    def activate(gates):
        # One sigmoid + one tanh over the whole gate vreg, then static lane slices.
        act = jnp.where(is_g, jnp.tanh(gates), jax.nn.sigmoid(gates))
        return (act[:, 0:H], act[:, H:2 * H], act[:, 2 * H:3 * H], act[:, 3 * H:4 * H])

    def step(t, carry):
        h1, c1, h2, c2 = carry
        # layer 1: input projection precomputed; only the recurrent matmul on the chain
        g1 = gx1_ref[pl.ds(t, 1), :] + jnp.dot(h1, whh1, preferred_element_type=f32)
        i1, f1, gg1, o1 = activate(g1)
        c1 = f1 * c1 + i1 * gg1
        h1 = o1 * jnp.tanh(c1)
        # layer 2: single fused [1,2H] x [2H,4H] matmul (input + recurrent projection)
        hcat = jnp.concatenate([h1, h2], axis=1)
        g2 = jnp.dot(hcat, w2cat, preferred_element_type=f32) + b2
        i2, f2, gg2, o2 = activate(g2)
        c2 = f2 * c2 + i2 * gg2
        h2 = o2 * jnp.tanh(c2)
        h2seq_ref[pl.ds(t, 1), :] = h2           # VMEM scratch, read back after the loop
        return (h1, c1, h2, c2)

    zero = jnp.zeros((1, H), f32)
    lax.fori_loop(0, N, step, (zero, zero, zero, zero), unroll=True)

    # ---- 3. MLP head on h_1_l2 (4 layers, ReLU between)   (bf16 operands, f32 acc)
    h = h2seq_ref[...]
    h = jnp.maximum(jnp.dot(h.astype(bf16), w0_ref[...].astype(bf16),
                            preferred_element_type=f32) + b0_ref[...], 0.0)
    h = jnp.maximum(jnp.dot(h.astype(bf16), w1_ref[...].astype(bf16),
                            preferred_element_type=f32) + b1m_ref[...], 0.0)
    h = jnp.maximum(jnp.dot(h.astype(bf16), w2_ref[...].astype(bf16),
                            preferred_element_type=f32) + b2m_ref[...], 0.0)
    # classifier weights are pre-padded to a lane-dense 128-wide output slab
    out_ref[...] = jnp.dot(h.astype(bf16), w3_ref[...].astype(bf16),
                           preferred_element_type=f32) + b3_ref[...]


# ------------------------------------------------------------------ MOST module (JAX/Pallas)
class MOSTPallas:
    def __init__(self, n_in, n_h, nb_classes, key):
        self.n_in, self.n_h, self.nb_classes = n_in, n_h, nb_classes
        ks = jax.random.split(key, 12)
        s = 0.1

        # graph-conv embedding (in_channels=n_in -> hidden_dim=n_h)
        self.w_gc = s * jax.random.normal(ks[0], (n_in, n_h), jnp.float32)
        self.b_gc = jnp.zeros((1, n_h), jnp.float32)

        # 2-layer LSTM context (nl_edge=2); combined bias b = b_ih + b_hh
        self.wih1 = s * jax.random.normal(ks[1], (n_h, 4 * n_h), jnp.float32)
        self.whh1 = s * jax.random.normal(ks[2], (n_h, 4 * n_h), jnp.float32)
        self.b1 = jnp.zeros((1, 4 * n_h), jnp.float32)
        wih2 = s * jax.random.normal(ks[3], (n_h, 4 * n_h), jnp.float32)
        whh2 = s * jax.random.normal(ks[4], (n_h, 4 * n_h), jnp.float32)
        self.w2cat = jnp.concatenate([wih2, whh2], axis=0)       # [2H, 4H]
        self.b2 = jnp.zeros((1, 4 * n_h), jnp.float32)

        # 4-layer MLP: n_h -> n_h/2 -> n_h/2 -> n_h/2 -> nb_classes
        hd = n_h // 2
        self.mlp_pre = (
            s * jax.random.normal(ks[5], (n_h, hd), jnp.float32), jnp.zeros((1, hd), jnp.float32),
            s * jax.random.normal(ks[6], (hd, hd), jnp.float32), jnp.zeros((1, hd), jnp.float32),
            s * jax.random.normal(ks[7], (hd, hd), jnp.float32), jnp.zeros((1, hd), jnp.float32),
        )
        # classifier layer padded to a lane-dense (128-wide) output slab
        w3 = s * jax.random.normal(ks[8], (hd, nb_classes), jnp.float32)
        self.c_pad = _round_up(nb_classes, LANE)
        self.w3p = jnp.zeros((hd, self.c_pad), jnp.float32).at[:, :nb_classes].set(w3)
        self.b3p = jnp.zeros((1, self.c_pad), jnp.float32)

    def __call__(self, seq1, subgraph, adj, sparse=False, msk=None,
                 samp_bias1=None, samp_bias2=None):
        del subgraph, sparse, msk, samp_bias1, samp_bias2   # unused by the reference forward
        N = seq1.shape[0]
        n_h = self.n_h
        kernel = functools.partial(most_fused_kernel, hidden_dim=n_h)
        vmem = pl.BlockSpec(memory_space=pltpu.MemorySpace.VMEM)

        out_pad = pl.pallas_call(
            kernel,
            out_shape=jax.ShapeDtypeStruct((N, self.c_pad), jnp.float32),
            in_specs=[vmem] * 17,
            out_specs=vmem,
            scratch_shapes=[
                pltpu.VMEM((N, 4 * n_h), jnp.float32),   # hoisted layer-1 input projection
                pltpu.VMEM((N, n_h), jnp.float32),       # h_1_l2 sequence (VMEM-resident)
            ],
        )(seq1, adj, self.w_gc, self.b_gc,
          self.wih1, self.whh1, self.b1,
          self.w2cat, self.b2,
          *self.mlp_pre, self.w3p, self.b3p)

        # output = self.MLP(h_1_l2); slice away the lane padding
        return out_pad[:, :self.nb_classes]


# ------------------------------------------------------------------ main
if __name__ == "__main__":
    key = jax.random.PRNGKey(0)
    k_x, k_a, k_p = jax.random.split(key, 3)

    N = 8            # number of graph nodes (sequence length for the LSTM context)
    n_in = 16        # input feature dim
    n_h = 32         # hidden dim
    nb_classes = 4

    seq1 = jax.random.normal(k_x, (N, n_in), jnp.float32)
    raw_adj = jax.random.uniform(k_a, (N, N), jnp.float32)
    adj = raw_adj / jnp.sum(raw_adj, axis=-1, keepdims=True)   # row-normalized dense adj
    subgraph = jnp.eye(N, dtype=jnp.float32)                   # unused by forward

    model = MOSTPallas(n_in, n_h, nb_classes, k_p)
    out = model(seq1, subgraph, adj, sparse=False, msk=None,
                samp_bias1=None, samp_bias2=None)
    out = jax.block_until_ready(out)

    assert out.shape == (N, nb_classes), out.shape
    assert jnp.all(jnp.isfinite(out))
    print("KERNEL_OK")
</pallas_src>

<mosaic_0001>
module attributes {stable_mosaic.version = 11 : i64} {
  func.func @most_fused_kernel(%arg0: memref<8x16xf32, #tpu.memory_space<vmem>>, %arg1: memref<8x8xf32, #tpu.memory_space<vmem>>, %arg2: memref<16x32xf32, #tpu.memory_space<vmem>>, %arg3: memref<1x32xf32, #tpu.memory_space<vmem>>, %arg4: memref<32x128xf32, #tpu.memory_space<vmem>>, %arg5: memref<32x128xf32, #tpu.memory_space<vmem>>, %arg6: memref<1x128xf32, #tpu.memory_space<vmem>>, %arg7: memref<64x128xf32, #tpu.memory_space<vmem>>, %arg8: memref<1x128xf32, #tpu.memory_space<vmem>>, %arg9: memref<32x16xf32, #tpu.memory_space<vmem>>, %arg10: memref<1x16xf32, #tpu.memory_space<vmem>>, %arg11: memref<16x16xf32, #tpu.memory_space<vmem>>, %arg12: memref<1x16xf32, #tpu.memory_space<vmem>>, %arg13: memref<16x16xf32, #tpu.memory_space<vmem>>, %arg14: memref<1x16xf32, #tpu.memory_space<vmem>>, %arg15: memref<16x128xf32, #tpu.memory_space<vmem>>, %arg16: memref<1x128xf32, #tpu.memory_space<vmem>>, %arg17: memref<8x128xf32, #tpu.memory_space<vmem>>, %arg18: memref<8x128xf32, #tpu.memory_space<vmem>>, %arg19: memref<8x32xf32, #tpu.memory_space<vmem>>) attributes {dimension_semantics = [], scalar_prefetch = 0 : i64, scratch_operands = 2 : i64, tpu.core_type = #tpu.core_type<tc>} {
    %c0 = arith.constant 0 : index
    %c0_0 = arith.constant 0 : index
    %0 = vector.load %arg0[%c0, %c0_0] : memref<8x16xf32, #tpu.memory_space<vmem>>, vector<8x16xf32>
    %1 = arith.truncf %0 : vector<8x16xf32> to vector<8x16xbf16>
    %c0_1 = arith.constant 0 : index
    %c0_2 = arith.constant 0 : index
    %2 = vector.load %arg2[%c0_1, %c0_2] : memref<16x32xf32, #tpu.memory_space<vmem>>, vector<16x32xf32>
    %3 = arith.truncf %2 : vector<16x32xf32> to vector<16x32xbf16>
    %cst = arith.constant dense<0.000000e+00> : vector<8x32xf32>
    %4 = tpu.matmul %1, %3, %cst {dimension_numbers = #tpu.dot_dimension_numbers<[1], [0], [0], [1], [0, 0, 1, 1], [], []>} : vector<8x16xbf16>, vector<16x32xbf16>, vector<8x32xf32> -> vector<8x32xf32>
    %c0_3 = arith.constant 0 : index
    %c0_4 = arith.constant 0 : index
    %5 = vector.load %arg1[%c0_3, %c0_4] : memref<8x8xf32, #tpu.memory_space<vmem>>, vector<8x8xf32>
    %6 = arith.truncf %5 : vector<8x8xf32> to vector<8x8xbf16>
    %7 = arith.truncf %4 : vector<8x32xf32> to vector<8x32xbf16>
    %cst_5 = arith.constant dense<0.000000e+00> : vector<8x32xf32>
    %8 = tpu.matmul %6, %7, %cst_5 {dimension_numbers = #tpu.dot_dimension_numbers<[1], [0], [0], [1], [0, 0, 1, 1], [], []>} : vector<8x8xbf16>, vector<8x32xbf16>, vector<8x32xf32> -> vector<8x32xf32>
    %c0_6 = arith.constant 0 : index
    %c0_7 = arith.constant 0 : index
    %9 = vector.load %arg3[%c0_6, %c0_7] : memref<1x32xf32, #tpu.memory_space<vmem>>, vector<1x32xf32>
    %10 = vector.broadcast %9 : vector<1x32xf32> to vector<8x32xf32>
    %11 = arith.addf %8, %10 : vector<8x32xf32>
    %12 = math.tanh %11 : vector<8x32xf32>
    %c0_8 = arith.constant 0 : index
    %c0_9 = arith.constant 0 : index
    %13 = vector.load %arg4[%c0_8, %c0_9] : memref<32x128xf32, #tpu.memory_space<vmem>>, vector<32x128xf32>
    %cst_10 = arith.constant dense<0.000000e+00> : vector<8x128xf32>
    %14 = tpu.matmul %12, %13, %cst_10 {dimension_numbers = #tpu.dot_dimension_numbers<[1], [0], [0], [1], [0, 0, 1, 1], [], []>} : vector<8x32xf32>, vector<32x128xf32>, vector<8x128xf32> -> vector<8x128xf32>
    %c0_11 = arith.constant 0 : index
    %c0_12 = arith.constant 0 : index
    %15 = vector.load %arg6[%c0_11, %c0_12] : memref<1x128xf32, #tpu.memory_space<vmem>>, vector<1x128xf32>
    %16 = vector.broadcast %15 : vector<1x128xf32> to vector<8x128xf32>
    %17 = arith.addf %14, %16 : vector<8x128xf32>
    %c0_13 = arith.constant 0 : index
    %c0_14 = arith.constant 0 : index
    %18 = vector.load %arg18[%c0_13, %c0_14] : memref<8x128xf32, #tpu.memory_space<vmem>>, vector<8x128xf32>
    tpu.vector_store %arg18[%c0_13, %c0_14], %17 {strides = array<i32>} : memref<8x128xf32, #tpu.memory_space<vmem>>, vector<8x128xf32>,
    %c0_15 = arith.constant 0 : index
    %c0_16 = arith.constant 0 : index
    %19 = vector.load %arg5[%c0_15, %c0_16] : memref<32x128xf32, #tpu.memory_space<vmem>>, vector<32x128xf32>
    %c0_17 = arith.constant 0 : index
    %c0_18 = arith.constant 0 : index
    %20 = vector.load %arg7[%c0_17, %c0_18] : memref<64x128xf32, #tpu.memory_space<vmem>>, vector<64x128xf32>
    %c0_19 = arith.constant 0 : index
    %c0_20 = arith.constant 0 : index
    %21 = vector.load %arg8[%c0_19, %c0_20] : memref<1x128xf32, #tpu.memory_space<vmem>>, vector<1x128xf32>
    %22 = tpu.iota {dimensions = array<i32: 1>} : vector<1x128xi32>
    %c64_i32 = arith.constant 64 : i32
    %23 = vector.broadcast %c64_i32 : i32 to vector<1x128xi32>
    %24 = arith.cmpi sge, %22, %23 : vector<1x128xi32>
    %c96_i32 = arith.constant 96 : i32
    %25 = vector.broadcast %c96_i32 : i32 to vector<1x128xi32>
    %26 = arith.cmpi slt, %22, %25 : vector<1x128xi32>
    %27 = arith.andi %24, %26 : vector<1x128xi1>
    %cst_21 = arith.constant 0.000000e+00 : f32
    %28 = vector.broadcast %cst_21 : f32 to vector<1x32xf32>
    %c0_i32 = arith.constant 0 : i32
    %29 = arith.index_cast %c0_i32 : i32 to index
    %c0_22 = arith.constant 0 : index
    %30 = vector.load %arg18[%29, %c0_22] : memref<8x128xf32, #tpu.memory_space<vmem>>, vector<1x128xf32>
    %cst_23 = arith.constant dense<0.000000e+00> : vector<1x128xf32>
    %31 = tpu.matmul %28, %19, %cst_23 {dimension_numbers = #tpu.dot_dimension_numbers<[1], [0], [0], [1], [0, 0, 1, 1], [], []>} : vector<1x32xf32>, vector<32x128xf32>, vector<1x128xf32> -> vector<1x128xf32>
    %32 = arith.addf %30, %31 : vector<1x128xf32>
    %33 = math.tanh %32 : vector<1x128xf32>
    %34 = arith.negf %32 : vector<1x128xf32>
    %35 = math.exp %34 : vector<1x128xf32>
    %cst_24 = arith.constant 1.000000e+00 : f32
    %36 = vector.broadcast %cst_24 : f32 to vector<1x128xf32>
    %37 = arith.addf %36, %35 : vector<1x128xf32>
    %38 = arith.divf %36, %37 : vector<1x128xf32>
    %39 = arith.select %27, %33, %38 : vector<1x128xi1>, vector<1x128xf32>
    %40 = vector.extract_strided_slice %39 {offsets = [0, 0], sizes = [1, 32], strides = [1, 1]} : vector<1x128xf32> to vector<1x32xf32>
    %41 = vector.extract_strided_slice %39 {offsets = [0, 32], sizes = [1, 32], strides = [1, 1]} : vector<1x128xf32> to vector<1x32xf32>
    %42 = vector.extract_strided_slice %39 {offsets = [0, 64], sizes = [1, 32], strides = [1, 1]} : vector<1x128xf32> to vector<1x32xf32>
    %43 = vector.extract_strided_slice %39 {offsets = [0, 96], sizes = [1, 32], strides = [1, 1]} : vector<1x128xf32> to vector<1x32xf32>
    %44 = arith.mulf %41, %28 : vector<1x32xf32>
    %45 = arith.mulf %40, %42 : vector<1x32xf32>
    %46 = arith.addf %44, %45 : vector<1x32xf32>
    %47 = math.tanh %46 : vector<1x32xf32>
    %48 = arith.mulf %43, %47 : vector<1x32xf32>
    %49 = tpu.concatenate %48, %28 in 1 : vector<1x32xf32>, vector<1x32xf32> -> vector<1x64xf32>
    %cst_25 = arith.constant dense<0.000000e+00> : vector<1x128xf32>
    %50 = tpu.matmul %49, %20, %cst_25 {dimension_numbers = #tpu.dot_dimension_numbers<[1], [0], [0], [1], [0, 0, 1, 1], [], []>} : vector<1x64xf32>, vector<64x128xf32>, vector<1x128xf32> -> vector<1x128xf32>
    %51 = arith.addf %50, %21 : vector<1x128xf32>
    %52 = math.tanh %51 : vector<1x128xf32>
    %53 = arith.negf %51 : vector<1x128xf32>
    %54 = math.exp %53 : vector<1x128xf32>
    %cst_26 = arith.constant 1.000000e+00 : f32
    %55 = vector.broadcast %cst_26 : f32 to vector<1x128xf32>
    %56 = arith.addf %55, %54 : vector<1x128xf32>
    %57 = arith.divf %55, %56 : vector<1x128xf32>
    %58 = arith.select %27, %52, %57 : vector<1x128xi1>, vector<1x128xf32>
    %59 = vector.extract_strided_slice %58 {offsets = [0, 0], sizes = [1, 32], strides = [1, 1]} : vector<1x128xf32> to vector<1x32xf32>
    %60 = vector.extract_strided_slice %58 {offsets = [0, 32], sizes = [1, 32], strides = [1, 1]} : vector<1x128xf32> to vector<1x32xf32>
    %61 = vector.extract_strided_slice %58 {offsets = [0, 64], sizes = [1, 32], strides = [1, 1]} : vector<1x128xf32> to vector<1x32xf32>
    %62 = vector.extract_strided_slice %58 {offsets = [0, 96], sizes = [1, 32], strides = [1, 1]} : vector<1x128xf32> to vector<1x32xf32>
    %63 = arith.mulf %60, %28 : vector<1x32xf32>
    %64 = arith.mulf %59, %61 : vector<1x32xf32>
    %65 = arith.addf %63, %64 : vector<1x32xf32>
    %66 = math.tanh %65 : vector<1x32xf32>
    %67 = arith.mulf %62, %66 : vector<1x32xf32>
    %68 = arith.index_cast %c0_i32 : i32 to index
    %c0_27 = arith.constant 0 : index
    %69 = vector.load %arg19[%68, %c0_27] : memref<8x32xf32, #tpu.memory_space<vmem>>, vector<1x32xf32>
    tpu.vector_store %arg19[%68, %c0_27], %67 {strides = array<i32>} : memref<8x32xf32, #tpu.memory_space<vmem>>, vector<1x32xf32>,
    %c1_i32 = arith.constant 1 : i32
    %70 = arith.index_cast %c1_i32 : i32 to index
    %c0_28 = arith.constant 0 : index
    %71 = vector.load %arg18[%70, %c0_28] : memref<8x128xf32, #tpu.memory_space<vmem>>, vector<1x128xf32>
    %cst_29 = arith.constant dense<0.000000e+00> : vector<1x128xf32>
    %72 = tpu.matmul %48, %19, %cst_29 {dimension_numbers = #tpu.dot_dimension_numbers<[1], [0], [0], [1], [0, 0, 1, 1], [], []>} : vector<1x32xf32>, vector<32x128xf32>, vector<1x128xf32> -> vector<1x128xf32>
    %73 = arith.addf %71, %72 : vector<1x128xf32>
    %74 = math.tanh %73 : vector<1x128xf32>
    %75 = arith.negf %73 : vector<1x128xf32>
    %76 = math.exp %75 : vector<1x128xf32>
    %cst_30 = arith.constant 1.000000e+00 : f32
    %77 = vector.broadcast %cst_30 : f32 to vector<1x128xf32>
    %78 = arith.addf %77, %76 : vector<1x128xf32>
    %79 = arith.divf %77, %78 : vector<1x128xf32>
    %80 = arith.select %27, %74, %79 : vector<1x128xi1>, vector<1x128xf32>
    %81 = vector.extract_strided_slice %80 {offsets = [0, 0], sizes = [1, 32], strides = [1, 1]} : vector<1x128xf32> to vector<1x32xf32>
    %82 = vector.extract_strided_slice %80 {offsets = [0, 32], sizes = [1, 32], strides = [1, 1]} : vector<1x128xf32> to vector<1x32xf32>
    %83 = vector.extract_strided_slice %80 {offsets = [0, 64], sizes = [1, 32], strides = [1, 1]} : vector<1x128xf32> to vector<1x32xf32>
    %84 = vector.extract_strided_slice %80 {offsets = [0, 96], sizes = [1, 32], strides = [1, 1]} : vector<1x128xf32> to vector<1x32xf32>
    %85 = arith.mulf %82, %46 : vector<1x32xf32>
    %86 = arith.mulf %81, %83 : vector<1x32xf32>
    %87 = arith.addf %85, %86 : vector<1x32xf32>
    %88 = math.tanh %87 : vector<1x32xf32>
    %89 = arith.mulf %84, %88 : vector<1x32xf32>
    %90 = tpu.concatenate %89, %67 in 1 : vector<1x32xf32>, vector<1x32xf32> -> vector<1x64xf32>
    %cst_31 = arith.constant dense<0.000000e+00> : vector<1x128xf32>
    %91 = tpu.matmul %90, %20, %cst_31 {dimension_numbers = #tpu.dot_dimension_numbers<[1], [0], [0], [1], [0, 0, 1, 1], [], []>} : vector<1x64xf32>, vector<64x128xf32>, vector<1x128xf32> -> vector<1x128xf32>
    %92 = arith.addf %91, %21 : vector<1x128xf32>
    %93 = math.tanh %92 : vector<1x128xf32>
    %94 = arith.negf %92 : vector<1x128xf32>
    %95 = math.exp %94 : vector<1x128xf32>
    %cst_32 = arith.constant 1.000000e+00 : f32
    %96 = vector.broadcast %cst_32 : f32 to vector<1x128xf32>
    %97 = arith.addf %96, %95 : vector<1x128xf32>
    %98 = arith.divf %96, %97 : vector<1x128xf32>
    %99 = arith.select %27, %93, %98 : vector<1x128xi1>, vector<1x128xf32>
    %100 = vector.extract_strided_slice %99 {offsets = [0, 0], sizes = [1, 32], strides = [1, 1]} : vector<1x128xf32> to vector<1x32xf32>
    %101 = vector.extract_strided_slice %99 {offsets = [0, 32], sizes = [1, 32], strides = [1, 1]} : vector<1x128xf32> to vector<1x32xf32>
    %102 = vector.extract_strided_slice %99 {offsets = [0, 64], sizes = [1, 32], strides = [1, 1]} : vector<1x128xf32> to vector<1x32xf32>
    %103 = vector.extract_strided_slice %99 {offsets = [0, 96], sizes = [1, 32], strides = [1, 1]} : vector<1x128xf32> to vector<1x32xf32>
    %104 = arith.mulf %101, %65 : vector<1x32xf32>
    %105 = arith.mulf %100, %102 : vector<1x32xf32>
    %106 = arith.addf %104, %105 : vector<1x32xf32>
    %107 = math.tanh %106 : vector<1x32xf32>
    %108 = arith.mulf %103, %107 : vector<1x32xf32>
    %109 = arith.index_cast %c1_i32 : i32 to index
    %c0_33 = arith.constant 0 : index
    %110 = vector.load %arg19[%109, %c0_33] : memref<8x32xf32, #tpu.memory_space<vmem>>, vector<1x32xf32>
    tpu.vector_store %arg19[%109, %c0_33], %108 {strides = array<i32>} : memref<8x32xf32, #tpu.memory_space<vmem>>, vector<1x32xf32>,
    %c2_i32 = arith.constant 2 : i32
    %111 = arith.index_cast %c2_i32 : i32 to index
    %c0_34 = arith.constant 0 : index
    %112 = vector.load %arg18[%111, %c0_34] : memref<8x128xf32, #tpu.memory_space<vmem>>, vector<1x128xf32>
    %cst_35 = arith.constant dense<0.000000e+00> : vector<1x128xf32>
    %113 = tpu.matmul %89, %19, %cst_35 {dimension_numbers = #tpu.dot_dimension_numbers<[1], [0], [0], [1], [0, 0, 1, 1], [], []>} : vector<1x32xf32>, vector<32x128xf32>, vector<1x128xf32> -> vector<1x128xf32>
    %114 = arith.addf %112, %113 : vector<1x128xf32>
    %115 = math.tanh %114 : vector<1x128xf32>
    %116 = arith.negf %114 : vector<1x128xf32>
    %117 = math.exp %116 : vector<1x128xf32>
    %cst_36 = arith.constant 1.000000e+00 : f32
    %118 = vector.broadcast %cst_36 : f32 to vector<1x128xf32>
    %119 = arith.addf %118, %117 : vector<1x128xf32>
    %120 = arith.divf %118, %119 : vector<1x128xf32>
    %121 = arith.select %27, %115, %120 : vector<1x128xi1>, vector<1x128xf32>
    %122 = vector.extract_strided_slice %121 {offsets = [0, 0], sizes = [1, 32], strides = [1, 1]} : vector<1x128xf32> to vector<1x32xf32>
    %123 = vector.extract_strided_slice %121 {offsets = [0, 32], sizes = [1, 32], strides = [1, 1]} : vector<1x128xf32> to vector<1x32xf32>
    %124 = vector.extract_strided_slice %121 {offsets = [0, 64], sizes = [1, 32], strides = [1, 1]} : vector<1x128xf32> to vector<1x32xf32>
    %125 = vector.extract_strided_slice %121 {offsets = [0, 96], sizes = [1, 32], strides = [1, 1]} : vector<1x128xf32> to vector<1x32xf32>
    %126 = arith.mulf %123, %87 : vector<1x32xf32>
    %127 = arith.mulf %122, %124 : vector<1x32xf32>
    %128 = arith.addf %126, %127 : vector<1x32xf32>
    %129 = math.tanh %128 : vector<1x32xf32>
    %130 = arith.mulf %125, %129 : vector<1x32xf32>
    %131 = tpu.concatenate %130, %108 in 1 : vector<1x32xf32>, vector<1x32xf32> -> vector<1x64xf32>
    %cst_37 = arith.constant dense<0.000000e+00> : vector<1x128xf32>
    %132 = tpu.matmul %131, %20, %cst_37 {dimension_numbers = #tpu.dot_dimension_numbers<[1], [0], [0], [1], [0, 0, 1, 1], [], []>} : vector<1x64xf32>, vector<64x128xf32>, vector<1x128xf32> -> vector<1x128xf32>
    %133 = arith.addf %132, %21 : vector<1x128xf32>
    %134 = math.tanh %133 : vector<1x128xf32>
    %135 = arith.negf %133 : vector<1x128xf32>
    %136 = math.exp %135 : vector<1x128xf32>
    %cst_38 = arith.constant 1.000000e+00 : f32
    %137 = vector.broadcast %cst_38 : f32 to vector<1x128xf32>
    %138 = arith.addf %137, %136 : vector<1x128xf32>
    %139 = arith.divf %137, %138 : vector<1x128xf32>
    %140 = arith.select %27, %134, %139 : vector<1x128xi1>, vector<1x128xf32>
    %141 = vector.extract_strided_slice %140 {offsets = [0, 0], sizes = [1, 32], strides = [1, 1]} : vector<1x128xf32> to vector<1x32xf32>
    %142 = vector.extract_strided_slice %140 {offsets = [0, 32], sizes = [1, 32], strides = [1, 1]} : vector<1x128xf32> to vector<1x32xf32>
    %143 = vector.extract_strided_slice %140 {offsets = [0, 64], sizes = [1, 32], strides = [1, 1]} : vector<1x128xf32> to vector<1x32xf32>
    %144 = vector.extract_strided_slice %140 {offsets = [0, 96], sizes = [1, 32], strides = [1, 1]} : vector<1x128xf32> to vector<1x32xf32>
    %145 = arith.mulf %142, %106 : vector<1x32xf32>
    %146 = arith.mulf %141, %143 : vector<1x32xf32>
    %147 = arith.addf %145, %146 : vector<1x32xf32>
    %148 = math.tanh %147 : vector<1x32xf32>
    %149 = arith.mulf %144, %148 : vector<1x32xf32>
    %150 = arith.index_cast %c2_i32 : i32 to index
    %c0_39 = arith.constant 0 : index
    %151 = vector.load %arg19[%150, %c0_39] : memref<8x32xf32, #tpu.memory_space<vmem>>, vector<1x32xf32>
    tpu.vector_store %arg19[%150, %c0_39], %149 {strides = array<i32>} : memref<8x32xf32, #tpu.memory_space<vmem>>, vector<1x32xf32>,
    %c3_i32 = arith.constant 3 : i32
    %152 = arith.index_cast %c3_i32 : i32 to index
    %c0_40 = arith.constant 0 : index
    %153 = vector.load %arg18[%152, %c0_40] : memref<8x128xf32, #tpu.memory_space<vmem>>, vector<1x128xf32>
    %cst_41 = arith.constant dense<0.000000e+00> : vector<1x128xf32>
    %154 = tpu.matmul %130, %19, %cst_41 {dimension_numbers = #tpu.dot_dimension_numbers<[1], [0], [0], [1], [0, 0, 1, 1], [], []>} : vector<1x32xf32>, vector<32x128xf32>, vector<1x128xf32> -> vector<1x128xf32>
    %155 = arith.addf %153, %154 : vector<1x128xf32>
    %156 = math.tanh %155 : vector<1x128xf32>
    %157 = arith.negf %155 : vector<1x128xf32>
    %158 = math.exp %157 : vector<1x128xf32>
    %cst_42 = arith.constant 1.000000e+00 : f32
    %159 = vector.broadcast %cst_42 : f32 to vector<1x128xf32>
    %160 = arith.addf %159, %158 : vector<1x128xf32>
    %161 = arith.divf %159, %160 : vector<1x128xf32>
    %162 = arith.select %27, %156, %161 : vector<1x128xi1>, vector<1x128xf32>
    %163 = vector.extract_strided_slice %162 {offsets = [0, 0], sizes = [1, 32], strides = [1, 1]} : vector<1x128xf32> to vector<1x32xf32>
    %164 = vector.extract_strided_slice %162 {offsets = [0, 32], sizes = [1, 32], strides = [1, 1]} : vector<1x128xf32> to vector<1x32xf32>
    %165 = vector.extract_strided_slice %162 {offsets = [0, 64], sizes = [1, 32], strides = [1, 1]} : vector<1x128xf32> to vector<1x32xf32>
    %166 = vector.extract_strided_slice %162 {offsets = [0, 96], sizes = [1, 32], strides = [1, 1]} : vector<1x128xf32> to vector<1x32xf32>
    %167 = arith.mulf %164, %128 : vector<1x32xf32>
    %168 = arith.mulf %163, %165 : vector<1x32xf32>
    %169 = arith.addf %167, %168 : vector<1x32xf32>
    %170 = math.tanh %169 : vector<1x32xf32>
    %171 = arith.mulf %166, %170 : vector<1x32xf32>
    %172 = tpu.concatenate %171, %149 in 1 : vector<1x32xf32>, vector<1x32xf32> -> vector<1x64xf32>
    %cst_43 = arith.constant dense<0.000000e+00> : vector<1x128xf32>
    %173 = tpu.matmul %172, %20, %cst_43 {dimension_numbers = #tpu.dot_dimension_numbers<[1], [0], [0], [1], [0, 0, 1, 1], [], []>} : vector<1x64xf32>, vector<64x128xf32>, vector<1x128xf32> -> vector<1x128xf32>
    %174 = arith.addf %173, %21 : vector<1x128xf32>
    %175 = math.tanh %174 : vector<1x128xf32>
    %176 = arith.negf %174 : vector<1x128xf32>
    %177 = math.exp %176 : vector<1x128xf32>
    %cst_44 = arith.constant 1.000000e+00 : f32
    %178 = vector.broadcast %cst_44 : f32 to vector<1x128xf32>
    %179 = arith.addf %178, %177 : vector<1x128xf32>
    %180 = arith.divf %178, %179 : vector<1x128xf32>
    %181 = arith.select %27, %175, %180 : vector<1x128xi1>, vector<1x128xf32>
    %182 = vector.extract_strided_slice %181 {offsets = [0, 0], sizes = [1, 32], strides = [1, 1]} : vector<1x128xf32> to vector<1x32xf32>
    %183 = vector.extract_strided_slice %181 {offsets = [0, 32], sizes = [1, 32], strides = [1, 1]} : vector<1x128xf32> to vector<1x32xf32>
    %184 = vector.extract_strided_slice %181 {offsets = [0, 64], sizes = [1, 32], strides = [1, 1]} : vector<1x128xf32> to vector<1x32xf32>
    %185 = vector.extract_strided_slice %181 {offsets = [0, 96], sizes = [1, 32], strides = [1, 1]} : vector<1x128xf32> to vector<1x32xf32>
    %186 = arith.mulf %183, %147 : vector<1x32xf32>
    %187 = arith.mulf %182, %184 : vector<1x32xf32>
    %188 = arith.addf %186, %187 : vector<1x32xf32>
    %189 = math.tanh %188 : vector<1x32xf32>
    %190 = arith.mulf %185, %189 : vector<1x32xf32>
    %191 = arith.index_cast %c3_i32 : i32 to index
    %c0_45 = arith.constant 0 : index
    %192 = vector.load %arg19[%191, %c0_45] : memref<8x32xf32, #tpu.memory_space<vmem>>, vector<1x32xf32>
    tpu.vector_store %arg19[%191, %c0_45], %190 {strides = array<i32>} : memref<8x32xf32, #tpu.memory_space<vmem>>, vector<1x32xf32>,
    %c4_i32 = arith.constant 4 : i32
    %193 = arith.index_cast %c4_i32 : i32 to index
    %c0_46 = arith.constant 0 : index
    %194 = vector.load %arg18[%193, %c0_46] : memref<8x128xf32, #tpu.memory_space<vmem>>, vector<1x128xf32>
    %cst_47 = arith.constant dense<0.000000e+00> : vector<1x128xf32>
    %195 = tpu.matmul %171, %19, %cst_47 {dimension_numbers = #tpu.dot_dimension_numbers<[1], [0], [0], [1], [0, 0, 1, 1], [], []>} : vector<1x32xf32>, vector<32x128xf32>, vector<1x128xf32> -> vector<1x128xf32>
    %196 = arith.addf %194, %195 : vector<1x128xf32>
    %197 = math.tanh %196 : vector<1x128xf32>
    %198 = arith.negf %196 : vector<1x128xf32>
    %199 = math.exp %198 : vector<1x128xf32>
    %cst_48 = arith.constant 1.000000e+00 : f32
    %200 = vector.broadcast %cst_48 : f32 to vector<1x128xf32>
    %201 = arith.addf %200, %199 : vector<1x128xf32>
    %202 = arith.divf %200, %201 : vector<1x128xf32>
    %203 = arith.select %27, %197, %202 : vector<1x128xi1>, vector<1x128xf32>
    %204 = vector.extract_strided_slice %203 {offsets = [0, 0], sizes = [1, 32], strides = [1, 1]} : vector<1x128xf32> to vector<1x32xf32>
    %205 = vector.extract_strided_slice %203 {offsets = [0, 32], sizes = [1, 32], strides = [1, 1]} : vector<1x128xf32> to vector<1x32xf32>
    %206 = vector.extract_strided_slice %203 {offsets = [0, 64], sizes = [1, 32], strides = [1, 1]} : vector<1x128xf32> to vector<1x32xf32>
    %207 = vector.extract_strided_slice %203 {offsets = [0, 96], sizes = [1, 32], strides = [1, 1]} : vector<1x128xf32> to vector<1x32xf32>
    %208 = arith.mulf %205, %169 : vector<1x32xf32>
    %209 = arith.mulf %204, %206 : vector<1x32xf32>
    %210 = arith.addf %208, %209 : vector<1x32xf32>
    %211 = math.tanh %210 : vector<1x32xf32>
    %212 = arith.mulf %207, %211 : vector<1x32xf32>
    %213 = tpu.concatenate %212, %190 in 1 : vector<1x32xf32>, vector<1x32xf32> -> vector<1x64xf32>
    %cst_49 = arith.constant dense<0.000000e+00> : vector<1x128xf32>
    %214 = tpu.matmul %213, %20, %cst_49 {dimension_numbers = #tpu.dot_dimension_numbers<[1], [0], [0], [1], [0, 0, 1, 1], [], []>} : vector<1x64xf32>, vector<64x128xf32>, vector<1x128xf32> -> vector<1x128xf32>
    %215 = arith.addf %214, %21 : vector<1x128xf32>
    %216 = math.tanh %215 : vector<1x128xf32>
    %217 = arith.negf %215 : vector<1x128xf32>
    %218 = math.exp %217 : vector<1x128xf32>
    %cst_50 = arith.constant 1.000000e+00 : f32
    %219 = vector.broadcast %cst_50 : f32 to vector<1x128xf32>
    %220 = arith.addf %219, %218 : vector<1x128xf32>
    %221 = arith.divf %219, %220 : vector<1x128xf32>
    %222 = arith.select %27, %216, %221 : vector<1x128xi1>, vector<1x128xf32>
    %223 = vector.extract_strided_slice %222 {offsets = [0, 0], sizes = [1, 32], strides = [1, 1]} : vector<1x128xf32> to vector<1x32xf32>
    %224 = vector.extract_strided_slice %222 {offsets = [0, 32], sizes = [1, 32], strides = [1, 1]} : vector<1x128xf32> to vector<1x32xf32>
    %225 = vector.extract_strided_slice %222 {offsets = [0, 64], sizes = [1, 32], strides = [1, 1]} : vector<1x128xf32> to vector<1x32xf32>
    %226 = vector.extract_strided_slice %222 {offsets = [0, 96], sizes = [1, 32], strides = [1, 1]} : vector<1x128xf32> to vector<1x32xf32>
    %227 = arith.mulf %224, %188 : vector<1x32xf32>
    %228 = arith.mulf %223, %225 : vector<1x32xf32>
    %229 = arith.addf %227, %228 : vector<1x32xf32>
    %230 = math.tanh %229 : vector<1x32xf32>
    %231 = arith.mulf %226, %230 : vector<1x32xf32>
    %232 = arith.index_cast %c4_i32 : i32 to index
    %c0_51 = arith.constant 0 : index
    %233 = vector.load %arg19[%232, %c0_51] : memref<8x32xf32, #tpu.memory_space<vmem>>, vector<1x32xf32>
    tpu.vector_store %arg19[%232, %c0_51], %231 {strides = array<i32>} : memref<8x32xf32, #tpu.memory_space<vmem>>, vector<1x32xf32>,
    %c5_i32 = arith.constant 5 : i32
    %234 = arith.index_cast %c5_i32 : i32 to index
    %c0_52 = arith.constant 0 : index
    %235 = vector.load %arg18[%234, %c0_52] : memref<8x128xf32, #tpu.memory_space<vmem>>, vector<1x128xf32>
    %cst_53 = arith.constant dense<0.000000e+00> : vector<1x128xf32>
    %236 = tpu.matmul %212, %19, %cst_53 {dimension_numbers = #tpu.dot_dimension_numbers<[1], [0], [0], [1], [0, 0, 1, 1], [], []>} : vector<1x32xf32>, vector<32x128xf32>, vector<1x128xf32> -> vector<1x128xf32>
    %237 = arith.addf %235, %236 : vector<1x128xf32>
    %238 = math.tanh %237 : vector<1x128xf32>
    %239 = arith.negf %237 : vector<1x128xf32>
    %240 = math.exp %239 : vector<1x128xf32>
    %cst_54 = arith.constant 1.000000e+00 : f32
    %241 = vector.broadcast %cst_54 : f32 to vector<1x128xf32>
    %242 = arith.addf %241, %240 : vector<1x128xf32>
    %243 = arith.divf %241, %242 : vector<1x128xf32>
    %244 = arith.select %27, %238, %243 : vector<1x128xi1>, vector<1x128xf32>
    %245 = vector.extract_strided_slice %244 {offsets = [0, 0], sizes = [1, 32], strides = [1, 1]} : vector<1x128xf32> to vector<1x32xf32>
    %246 = vector.extract_strided_slice %244 {offsets = [0, 32], sizes = [1, 32], strides = [1, 1]} : vector<1x128xf32> to vector<1x32xf32>
    %247 = vector.extract_strided_slice %244 {offsets = [0, 64], sizes = [1, 32], strides = [1, 1]} : vector<1x128xf32> to vector<1x32xf32>
    %248 = vector.extract_strided_slice %244 {offsets = [0, 96], sizes = [1, 32], strides = [1, 1]} : vector<1x128xf32> to vector<1x32xf32>
    %249 = arith.mulf %246, %210 : vector<1x32xf32>
    %250 = arith.mulf %245, %247 : vector<1x32xf32>
    %251 = arith.addf %249, %250 : vector<1x32xf32>
    %252 = math.tanh %251 : vector<1x32xf32>
    %253 = arith.mulf %248, %252 : vector<1x32xf32>
    %254 = tpu.concatenate %253, %231 in 1 : vector<1x32xf32>, vector<1x32xf32> -> vector<1x64xf32>
    %cst_55 = arith.constant dense<0.000000e+00> : vector<1x128xf32>
    %255 = tpu.matmul %254, %20, %cst_55 {dimension_numbers = #tpu.dot_dimension_numbers<[1], [0], [0], [1], [0, 0, 1, 1], [], []>} : vector<1x64xf32>, vector<64x128xf32>, vector<1x128xf32> -> vector<1x128xf32>
    %256 = arith.addf %255, %21 : vector<1x128xf32>
    %257 = math.tanh %256 : vector<1x128xf32>
    %258 = arith.negf %256 : vector<1x128xf32>
    %259 = math.exp %258 : vector<1x128xf32>
    %cst_56 = arith.constant 1.000000e+00 : f32
    %260 = vector.broadcast %cst_56 : f32 to vector<1x128xf32>
    %261 = arith.addf %260, %259 : vector<1x128xf32>
    %262 = arith.divf %260, %261 : vector<1x128xf32>
    %263 = arith.select %27, %257, %262 : vector<1x128xi1>, vector<1x128xf32>
    %264 = vector.extract_strided_slice %263 {offsets = [0, 0], sizes = [1, 32], strides = [1, 1]} : vector<1x128xf32> to vector<1x32xf32>
    %265 = vector.extract_strided_slice %263 {offsets = [0, 32], sizes = [1, 32], strides = [1, 1]} : vector<1x128xf32> to vector<1x32xf32>
    %266 = vector.extract_strided_slice %263 {offsets = [0, 64], sizes = [1, 32], strides = [1, 1]} : vector<1x128xf32> to vector<1x32xf32>
    %267 = vector.extract_strided_slice %263 {offsets = [0, 96], sizes = [1, 32], strides = [1, 1]} : vector<1x128xf32> to vector<1x32xf32>
    %268 = arith.mulf %265, %229 : vector<1x32xf32>
    %269 = arith.mulf %264, %266 : vector<1x32xf32>
    %270 = arith.addf %268, %269 : vector<1x32xf32>
    %271 = math.tanh %270 : vector<1x32xf32>
    %272 = arith.mulf %267, %271 : vector<1x32xf32>
    %273 = arith.index_cast %c5_i32 : i32 to index
    %c0_57 = arith.constant 0 : index
    %274 = vector.load %arg19[%273, %c0_57] : memref<8x32xf32, #tpu.memory_space<vmem>>, vector<1x32xf32>
    tpu.vector_store %arg19[%273, %c0_57], %272 {strides = array<i32>} : memref<8x32xf32, #tpu.memory_space<vmem>>, vector<1x32xf32>,
    %c6_i32 = arith.constant 6 : i32
    %275 = arith.index_cast %c6_i32 : i32 to index
    %c0_58 = arith.constant 0 : index
    %276 = vector.load %arg18[%275, %c0_58] : memref<8x128xf32, #tpu.memory_space<vmem>>, vector<1x128xf32>
    %cst_59 = arith.constant dense<0.000000e+00> : vector<1x128xf32>
    %277 = tpu.matmul %253, %19, %cst_59 {dimension_numbers = #tpu.dot_dimension_numbers<[1], [0], [0], [1], [0, 0, 1, 1], [], []>} : vector<1x32xf32>, vector<32x128xf32>, vector<1x128xf32> -> vector<1x128xf32>
    %278 = arith.addf %276, %277 : vector<1x128xf32>
    %279 = math.tanh %278 : vector<1x128xf32>
    %280 = arith.negf %278 : vector<1x128xf32>
    %281 = math.exp %280 : vector<1x128xf32>
    %cst_60 = arith.constant 1.000000e+00 : f32
    %282 = vector.broadcast %cst_60 : f32 to vector<1x128xf32>
    %283 = arith.addf %282, %281 : vector<1x128xf32>
    %284 = arith.divf %282, %283 : vector<1x128xf32>
    %285 = arith.select %27, %279, %284 : vector<1x128xi1>, vector<1x128xf32>
    %286 = vector.extract_strided_slice %285 {offsets = [0, 0], sizes = [1, 32], strides = [1, 1]} : vector<1x128xf32> to vector<1x32xf32>
    %287 = vector.extract_strided_slice %285 {offsets = [0, 32], sizes = [1, 32], strides = [1, 1]} : vector<1x128xf32> to vector<1x32xf32>
    %288 = vector.extract_strided_slice %285 {offsets = [0, 64], sizes = [1, 32], strides = [1, 1]} : vector<1x128xf32> to vector<1x32xf32>
    %289 = vector.extract_strided_slice %285 {offsets = [0, 96], sizes = [1, 32], strides = [1, 1]} : vector<1x128xf32> to vector<1x32xf32>
    %290 = arith.mulf %287, %251 : vector<1x32xf32>
    %291 = arith.mulf %286, %288 : vector<1x32xf32>
    %292 = arith.addf %290, %291 : vector<1x32xf32>
    %293 = math.tanh %292 : vector<1x32xf32>
    %294 = arith.mulf %289, %293 : vector<1x32xf32>
    %295 = tpu.concatenate %294, %272 in 1 : vector<1x32xf32>, vector<1x32xf32> -> vector<1x64xf32>
    %cst_61 = arith.constant dense<0.000000e+00> : vector<1x128xf32>
    %296 = tpu.matmul %295, %20, %cst_61 {dimension_numbers = #tpu.dot_dimension_numbers<[1], [0], [0], [1], [0, 0, 1, 1], [], []>} : vector<1x64xf32>, vector<64x128xf32>, vector<1x128xf32> -> vector<1x128xf32>
    %297 = arith.addf %296, %21 : vector<1x128xf32>
    %298 = math.tanh %297 : vector<1x128xf32>
    %299 = arith.negf %297 : vector<1x128xf32>
    %300 = math.exp %299 : vector<1x128xf32>
    %cst_62 = arith.constant 1.000000e+00 : f32
    %301 = vector.broadcast %cst_62 : f32 to vector<1x128xf32>
    %302 = arith.addf %301, %300 : vector<1x128xf32>
    %303 = arith.divf %301, %302 : vector<1x128xf32>
    %304 = arith.select %27, %298, %303 : vector<1x128xi1>, vector<1x128xf32>
    %305 = vector.extract_strided_slice %304 {offsets = [0, 0], sizes = [1, 32], strides = [1, 1]} : vector<1x128xf32> to vector<1x32xf32>
    %306 = vector.extract_strided_slice %304 {offsets = [0, 32], sizes = [1, 32], strides = [1, 1]} : vector<1x128xf32> to vector<1x32xf32>
    %307 = vector.extract_strided_slice %304 {offsets = [0, 64], sizes = [1, 32], strides = [1, 1]} : vector<1x128xf32> to vector<1x32xf32>
    %308 = vector.extract_strided_slice %304 {offsets = [0, 96], sizes = [1, 32], strides = [1, 1]} : vector<1x128xf32> to vector<1x32xf32>
    %309 = arith.mulf %306, %270 : vector<1x32xf32>
    %310 = arith.mulf %305, %307 : vector<1x32xf32>
    %311 = arith.addf %309, %310 : vector<1x32xf32>
    %312 = math.tanh %311 : vector<1x32xf32>
    %313 = arith.mulf %308, %312 : vector<1x32xf32>
    %314 = arith.index_cast %c6_i32 : i32 to index
    %c0_63 = arith.constant 0 : index
    %315 = vector.load %arg19[%314, %c0_63] : memref<8x32xf32, #tpu.memory_space<vmem>>, vector<1x32xf32>
    tpu.vector_store %arg19[%314, %c0_63], %313 {strides = array<i32>} : memref<8x32xf32, #tpu.memory_space<vmem>>, vector<1x32xf32>,
    %c7_i32 = arith.constant 7 : i32
    %316 = arith.index_cast %c7_i32 : i32 to index
    %c0_64 = arith.constant 0 : index
    %317 = vector.load %arg18[%316, %c0_64] : memref<8x128xf32, #tpu.memory_space<vmem>>, vector<1x128xf32>
    %cst_65 = arith.constant dense<0.000000e+00> : vector<1x128xf32>
    %318 = tpu.matmul %294, %19, %cst_65 {dimension_numbers = #tpu.dot_dimension_numbers<[1], [0], [0], [1], [0, 0, 1, 1], [], []>} : vector<1x32xf32>, vector<32x128xf32>, vector<1x128xf32> -> vector<1x128xf32>
    %319 = arith.addf %317, %318 : vector<1x128xf32>
    %320 = math.tanh %319 : vector<1x128xf32>
    %321 = arith.negf %319 : vector<1x128xf32>
    %322 = math.exp %321 : vector<1x128xf32>
    %cst_66 = arith.constant 1.000000e+00 : f32
    %323 = vector.broadcast %cst_66 : f32 to vector<1x128xf32>
    %324 = arith.addf %323, %322 : vector<1x128xf32>
    %325 = arith.divf %323, %324 : vector<1x128xf32>
    %326 = arith.select %27, %320, %325 : vector<1x128xi1>, vector<1x128xf32>
    %327 = vector.extract_strided_slice %326 {offsets = [0, 0], sizes = [1, 32], strides = [1, 1]} : vector<1x128xf32> to vector<1x32xf32>
    %328 = vector.extract_strided_slice %326 {offsets = [0, 32], sizes = [1, 32], strides = [1, 1]} : vector<1x128xf32> to vector<1x32xf32>
    %329 = vector.extract_strided_slice %326 {offsets = [0, 64], sizes = [1, 32], strides = [1, 1]} : vector<1x128xf32> to vector<1x32xf32>
    %330 = vector.extract_strided_slice %326 {offsets = [0, 96], sizes = [1, 32], strides = [1, 1]} : vector<1x128xf32> to vector<1x32xf32>
    %331 = arith.mulf %328, %292 : vector<1x32xf32>
    %332 = arith.mulf %327, %329 : vector<1x32xf32>
    %333 = arith.addf %331, %332 : vector<1x32xf32>
    %334 = math.tanh %333 : vector<1x32xf32>
    %335 = arith.mulf %330, %334 : vector<1x32xf32>
    %336 = tpu.concatenate %335, %313 in 1 : vector<1x32xf32>, vector<1x32xf32> -> vector<1x64xf32>
    %cst_67 = arith.constant dense<0.000000e+00> : vector<1x128xf32>
    %337 = tpu.matmul %336, %20, %cst_67 {dimension_numbers = #tpu.dot_dimension_numbers<[1], [0], [0], [1], [0, 0, 1, 1], [], []>} : vector<1x64xf32>, vector<64x128xf32>, vector<1x128xf32> -> vector<1x128xf32>
    %338 = arith.addf %337, %21 : vector<1x128xf32>
    %339 = math.tanh %338 : vector<1x128xf32>
    %340 = arith.negf %338 : vector<1x128xf32>
    %341 = math.exp %340 : vector<1x128xf32>
    %cst_68 = arith.constant 1.000000e+00 : f32
    %342 = vector.broadcast %cst_68 : f32 to vector<1x128xf32>
    %343 = arith.addf %342, %341 : vector<1x128xf32>
    %344 = arith.divf %342, %343 : vector<1x128xf32>
    %345 = arith.select %27, %339, %344 : vector<1x128xi1>, vector<1x128xf32>
    %346 = vector.extract_strided_slice %345 {offsets = [0, 0], sizes = [1, 32], strides = [1, 1]} : vector<1x128xf32> to vector<1x32xf32>
    %347 = vector.extract_strided_slice %345 {offsets = [0, 32], sizes = [1, 32], strides = [1, 1]} : vector<1x128xf32> to vector<1x32xf32>
    %348 = vector.extract_strided_slice %345 {offsets = [0, 64], sizes = [1, 32], strides = [1, 1]} : vector<1x128xf32> to vector<1x32xf32>
    %349 = vector.extract_strided_slice %345 {offsets = [0, 96], sizes = [1, 32], strides = [1, 1]} : vector<1x128xf32> to vector<1x32xf32>
    %350 = arith.mulf %347, %311 : vector<1x32xf32>
    %351 = arith.mulf %346, %348 : vector<1x32xf32>
    %352 = arith.addf %350, %351 : vector<1x32xf32>
    %353 = math.tanh %352 : vector<1x32xf32>
    %354 = arith.mulf %349, %353 : vector<1x32xf32>
    %355 = arith.index_cast %c7_i32 : i32 to index
    %c0_69 = arith.constant 0 : index
    %356 = vector.load %arg19[%355, %c0_69] : memref<8x32xf32, #tpu.memory_space<vmem>>, vector<1x32xf32>
    tpu.vector_store %arg19[%355, %c0_69], %354 {strides = array<i32>} : memref<8x32xf32, #tpu.memory_space<vmem>>, vector<1x32xf32>,
    %c8_i32 = arith.constant 8 : i32
    %c0_70 = arith.constant 0 : index
    %c0_71 = arith.constant 0 : index
    %357 = vector.load %arg19[%c0_70, %c0_71] : memref<8x32xf32, #tpu.memory_space<vmem>>, vector<8x32xf32>
    %358 = arith.truncf %357 : vector<8x32xf32> to vector<8x32xbf16>
    %c0_72 = arith.constant 0 : index
    %c0_73 = arith.constant 0 : index
    %359 = vector.load %arg9[%c0_72, %c0_73] : memref<32x16xf32, #tpu.memory_space<vmem>>, vector<32x16xf32>
    %360 = arith.truncf %359 : vector<32x16xf32> to vector<32x16xbf16>
    %cst_74 = arith.constant dense<0.000000e+00> : vector<8x16xf32>
    %361 = tpu.matmul %358, %360, %cst_74 {dimension_numbers = #tpu.dot_dimension_numbers<[1], [0], [0], [1], [0, 0, 1, 1], [], []>} : vector<8x32xbf16>, vector<32x16xbf16>, vector<8x16xf32> -> vector<8x16xf32>
    %c0_75 = arith.constant 0 : index
    %c0_76 = arith.constant 0 : index
    %362 = vector.load %arg10[%c0_75, %c0_76] : memref<1x16xf32, #tpu.memory_space<vmem>>, vector<1x16xf32>
    %363 = vector.broadcast %362 : vector<1x16xf32> to vector<8x16xf32>
    %364 = arith.addf %361, %363 : vector<8x16xf32>
    %cst_77 = arith.constant 0.000000e+00 : f32
    %365 = vector.broadcast %cst_77 : f32 to vector<8x16xf32>
    %366 = arith.maximumf %364, %365 : vector<8x16xf32>
    %367 = arith.truncf %366 : vector<8x16xf32> to vector<8x16xbf16>
    %c0_78 = arith.constant 0 : index
    %c0_79 = arith.constant 0 : index
    %368 = vector.load %arg11[%c0_78, %c0_79] : memref<16x16xf32, #tpu.memory_space<vmem>>, vector<16x16xf32>
    %369 = arith.truncf %368 : vector<16x16xf32> to vector<16x16xbf16>
    %cst_80 = arith.constant dense<0.000000e+00> : vector<8x16xf32>
    %370 = tpu.matmul %367, %369, %cst_80 {dimension_numbers = #tpu.dot_dimension_numbers<[1], [0], [0], [1], [0, 0, 1, 1], [], []>} : vector<8x16xbf16>, vector<16x16xbf16>, vector<8x16xf32> -> vector<8x16xf32>
    %c0_81 = arith.constant 0 : index
    %c0_82 = arith.constant 0 : index
    %371 = vector.load %arg12[%c0_81, %c0_82] : memref<1x16xf32, #tpu.memory_space<vmem>>, vector<1x16xf32>
    %372 = vector.broadcast %371 : vector<1x16xf32> to vector<8x16xf32>
    %373 = arith.addf %370, %372 : vector<8x16xf32>
    %cst_83 = arith.constant 0.000000e+00 : f32
    %374 = vector.broadcast %cst_83 : f32 to vector<8x16xf32>
    %375 = arith.maximumf %373, %374 : vector<8x16xf32>
    %376 = arith.truncf %375 : vector<8x16xf32> to vector<8x16xbf16>
    %c0_84 = arith.constant 0 : index
    %c0_85 = arith.constant 0 : index
    %377 = vector.load %arg13[%c0_84, %c0_85] : memref<16x16xf32, #tpu.memory_space<vmem>>, vector<16x16xf32>
    %378 = arith.truncf %377 : vector<16x16xf32> to vector<16x16xbf16>
    %cst_86 = arith.constant dense<0.000000e+00> : vector<8x16xf32>
    %379 = tpu.matmul %376, %378, %cst_86 {dimension_numbers = #tpu.dot_dimension_numbers<[1], [0], [0], [1], [0, 0, 1, 1], [], []>} : vector<8x16xbf16>, vector<16x16xbf16>, vector<8x16xf32> -> vector<8x16xf32>
    %c0_87 = arith.constant 0 : index
    %c0_88 = arith.constant 0 : index
    %380 = vector.load %arg14[%c0_87, %c0_88] : memref<1x16xf32, #tpu.memory_space<vmem>>, vector<1x16xf32>
    %381 = vector.broadcast %380 : vector<1x16xf32> to vector<8x16xf32>
    %382 = arith.addf %379, %381 : vector<8x16xf32>
    %cst_89 = arith.constant 0.000000e+00 : f32
    %383 = vector.broadcast %cst_89 : f32 to vector<8x16xf32>
    %384 = arith.maximumf %382, %383 : vector<8x16xf32>
    %385 = arith.truncf %384 : vector<8x16xf32> to vector<8x16xbf16>
    %c0_90 = arith.constant 0 : index
    %c0_91 = arith.constant 0 : index
    %386 = vector.load %arg15[%c0_90, %c0_91] : memref<16x128xf32, #tpu.memory_space<vmem>>, vector<16x128xf32>
    %387 = arith.truncf %386 : vector<16x128xf32> to vector<16x128xbf16>
    %cst_92 = arith.constant dense<0.000000e+00> : vector<8x128xf32>
    %388 = tpu.matmul %385, %387, %cst_92 {dimension_numbers = #tpu.dot_dimension_numbers<[1], [0], [0], [1], [0, 0, 1, 1], [], []>} : vector<8x16xbf16>, vector<16x128xbf16>, vector<8x128xf32> -> vector<8x128xf32>
    %c0_93 = arith.constant 0 : index
    %c0_94 = arith.constant 0 : index
    %389 = vector.load %arg16[%c0_93, %c0_94] : memref<1x128xf32, #tpu.memory_space<vmem>>, vector<1x128xf32>
    %390 = vector.broadcast %389 : vector<1x128xf32> to vector<8x128xf32>
    %391 = arith.addf %388, %390 : vector<8x128xf32>
    %c0_95 = arith.constant 0 : index
    %c0_96 = arith.constant 0 : index
    %392 = vector.load %arg17[%c0_95, %c0_96] : memref<8x128xf32, #tpu.memory_space<vmem>>, vector<8x128xf32>
    tpu.vector_store %arg17[%c0_95, %c0_96], %391 {strides = array<i32>} : memref<8x128xf32, #tpu.memory_space<vmem>>, vector<8x128xf32>,
    return
  }
}

</mosaic_0001>

<bundles_post_ra>
// kernel: tpu_custom_call.1
= control target key start
LH: loop header
LB: loop body
LE: loop exit
PB: predicated region body
PF: predicated region fallthrough
CT: control target
= control target key end

     0   :  { %s2415_s0 = inlined_call_operand.hbm [shape: f32[8,16], index: 0, kind: input, shape index: {}]   ;;  %s2416_s1 = inlined_call_operand.hbm [shape: f32[8,8], index: 1, kind: input, shape index: {}]   ;;  %s2417_s2 = inlined_call_operand.vmem [shape: f32[16,32], index: 2, kind: input, shape index: {}]   ;;  %s2418_s3 = inlined_call_operand.vmem [shape: f32[1,32], index: 3, kind: input, shape index: {}]   ;;  %s2419_s4 = inlined_call_operand.vmem [shape: f32[32,128], index: 4, kind: input, shape index: {}]   ;;  %s2420_s5 = inlined_call_operand.hbm [shape: f32[32,128], index: 5, kind: input, shape index: {}]   ;;  %s2421_s6 = inlined_call_operand.vmem [shape: f32[1,128], index: 6, kind: input, shape index: {}]   ;;  %s2422_s7 = inlined_call_operand.hbm [shape: f32[64,128], index: 7, kind: input, shape index: {}]   ;;  %s2423_s8 = inlined_call_operand.vmem [shape: f32[1,128], index: 8, kind: input, shape index: {}]   ;;  %s2424_s9 = inlined_call_operand.vmem [shape: f32[32,16], index: 9, kind: input, shape index: {}]   ;;  %s2425_s10 = inlined_call_operand.vmem [shape: f32[1,16], index: 10, kind: input, shape index: {}]   ;;  %s2426_s11 = inlined_call_operand.hbm [shape: f32[16,16], index: 11, kind: input, shape index: {}]   ;;  %s2427_s12 = inlined_call_operand.vmem [shape: f32[1,16], index: 12, kind: input, shape index: {}]   ;;  %s2428_s13 = inlined_call_operand.hbm [shape: f32[16,16], index: 13, kind: input, shape index: {}]   ;;  %s2429_s14 = inlined_call_operand.vmem [shape: f32[1,16], index: 14, kind: input, shape index: {}]   ;;  %s2430_s15 = inlined_call_operand.hbm [shape: f32[16,128], index: 15, kind: input, shape index: {}]   ;;  %s2431_s16 = inlined_call_operand.vmem [shape: f32[1,128], index: 16, kind: input, shape index: {}]   ;;  %s2432_s17 = inlined_call_operand.hbm [shape: f32[8,128], index: 17, kind: output, shape index: {}]  }
   0x1   :  { %2433 = sst [smem:[#allocation22_spill]] %s2415_s0 }
   0x2   :  { %2434 = sst [smem:[#allocation23_spill]] %s2416_s1 }
   0x3   :  { %22 = vsyncpa [#allocation5], 0 }
   0x4   :  { %23 = vsyncpa [#allocation8], 0 }
   0x5   :  { %24 = vsyncpa [#allocation11], 0 }
   0x6   :  { %25 = vsyncpa [#allocation14], 0  ;;  %s2435_s26 = sld [smem:[#allocation23_spill]] }
   0xc   :  { %s43_s27 = sshll.u32 %s2435_s26, 4  ;;  %s44_s27 = int_to_ptr.hbm [resolvable:$true] %s43_s27 }
   0xd   :  { %26 = vsyncpa [#allocation6], 0  ;;  %s1867_s28 = smov [#allocation7]   ;;  %s74_s18 = sshll.u32 %s2422_s7, 4  ;;  %s75_s18 = int_to_ptr.hbm [resolvable:$true] %s74_s18 }
   0xe   :  { %s45_s29 = sshll.u32 %s1867_s28, 4  ;;  %s1868_s19 = smov [#allocation10]   ;;  %s46_s29 = int_to_ptr.vmem [resolvable:$true] %s45_s29 }
   0xf   :  { %48 = dma.hbm_to_vmem [thread:$0]  %s44_s27, 128, %s46_s29, [#allocation8]  }
  0x10   :  { %s76_s1 = sshll.u32 %s1868_s19, 4  ;;  %s108_s22 = sshll.u32 %s2428_s13, 4  ;;  %s77_s1 = int_to_ptr.vmem [resolvable:$true] %s76_s1  ;;  %s109_s22 = int_to_ptr.hbm [resolvable:$true] %s108_s22 }
  0x11   :  { %s1869_s23 = smov 128   ;;  %s1870_s24 = smov 8  }
  0x12   :  { %82 = dma.hbm_to_vmem [thread:$0]  %s75_s18, 1024, %s77_s1, [#allocation11], %s1869_s23, %s1869_s23, %s1870_s24  }
  0x13   :  { %s2436_s27 = sld [smem:[#allocation22_spill]]  ;;  %s1871_s7 = smov [#allocation13]  }
  0x14   :  { %s110_s29 = sshll.u32 %s1871_s7, 4  ;;  %s1872_s13 = smov [#allocation4]   ;;  %s111_s29 = int_to_ptr.vmem [resolvable:$true] %s110_s29 }
  0x15   :  { %116 = dma.hbm_to_vmem [thread:$0]  %s109_s22, 256, %s111_s29, [#allocation14], %s1869_s23, %s1869_s23, %s1870_s24  }
  0x16   :  { %s34_s0 = sshll.u32 %s1872_s13, 4  ;;  %s59_s20 = sshll.u32 %s2420_s5, 4  ;;  %s35_s0 = int_to_ptr.vmem [resolvable:$true] %s34_s0  ;;  %s60_s20 = int_to_ptr.hbm [resolvable:$true] %s59_s20 }
  0x17   :  { %s93_s21 = sshll.u32 %s2426_s11, 4  ;;  %s1873_s25 = smov [#allocation9]   ;;  %s94_s21 = int_to_ptr.hbm [resolvable:$true] %s93_s21 }
  0x18   :  { %s61_s26 = sshll.u32 %s1873_s25, 4  ;;  %s1874_s22 = smov [#allocation12]   ;;  %s62_s26 = int_to_ptr.vmem [resolvable:$true] %s61_s26 }
  0x19   :  { %s32_s28 = sshll.u32 %s2436_s27, 4  ;;  %s95_s27 = sshll.u32 %s1874_s22, 4  ;;  %s33_s28 = int_to_ptr.hbm [resolvable:$true] %s32_s28  ;;  %s96_s27 = int_to_ptr.vmem [resolvable:$true] %s95_s27 }
  0x1a   :  { %37 = dma.hbm_to_vmem [thread:$0]  %s33_s28, 128, %s35_s0, [#allocation5]  }
  0x1b   :  { %67 = dma.hbm_to_vmem [thread:$0]  %s60_s20, 512, %s62_s26, [#allocation8], %s1869_s23, %s1869_s23, %s1870_s24  }
  0x1c   :  { %s123_s5 = sshll.u32 %s2430_s15, 4  ;;  %s1875_s11 = smov [#allocation15]   ;;  %s124_s5 = int_to_ptr.hbm [resolvable:$true] %s123_s5 }
  0x1d   :  { %101 = dma.hbm_to_vmem [thread:$0]  %s94_s21, 256, %s96_s27, [#allocation11], %s1869_s23, %s1869_s23, %s1870_s24  }
  0x1e   :  { %s125_s28 = sshll.u32 %s1875_s11, 4  ;;  %s126_s28 = int_to_ptr.vmem [resolvable:$true] %s125_s28 }
  0x1f   :  { %131 = dma.hbm_to_vmem [thread:$0]  %s124_s5, 256, %s126_s28, [#allocation14], %s1869_s23, %s1869_s23, %s1870_s24  }
  0x20   :  { %1857 = dma.done.wait [#allocation5], 128  }
  0x21   :  { %1858 = vsyncadd [#allocation5], 4294967168 }
  0x22   :  { %1859 = dma.done.wait [#allocation8], 640  }
  0x23   :  { %1860 = vsyncadd [#allocation8], 4294966656 }
  0x24   :  { %1861 = dma.done.wait [#allocation11], 1280  }
  0x25   :  { %1862 = vsyncadd [#allocation11], 4294966016 }
  0x26   :  { %1863 = dma.done.wait [#allocation14], 512  }
  0x27   :  { %1864 = vsyncadd [#allocation14], 4294966784  ;;  %v165_v0 = vld [vmem:[%s2417_s2] sm:$0xff]  ;;  %v166_v1 = vld [vmem:[%s2417_s2 + $0x8] sm:$0xff]  ;;  %vm168_vm0 = vcmask 130048   ;;  %vm196_vm1 = vcmask 1043456   ;;  %v260_v34 = vlaneseq }
  0x28   :  { %v163_v2 = vld [vmem:[#allocation4] sm:$0xff]  ;;  %v167_v3 = vpack.c.bf16 %v166_v1, %v165_v0  ;;  %v185_v6 = vld [vmem:[#allocation7] sm:$0xff]  ;;  %vm192_vm2 = vcmask 64512   ;;  %v215_v13 = vld [vmem:[%s2419_s4 + $0x8] sm:$0xff]  ;;  %v1876_v19 = vmov 0.0   ;;  %vm222_vm3 = vcmask 261120  }
  0x29   :  { %v164_v4 = vpack.c.bf16 %v163_v2, %v163_v2  ;;  %v186_v9 = vpack.c.bf16 %v185_v6, %v185_v6  ;;  %v217_v11 = vld [vmem:[%s2419_s4 + $0x18] sm:$0xff]  ;;  %v216_v12 = vld [vmem:[%s2419_s4 + $0x10] sm:$0xff]  ;;  %v214_v14 = vld [vmem:[%s2419_s4] sm:$0xff]  ;;  %v261_v36 = vand.u32 127, %v260_v34  ;;  %vm333_vm11 = vcmask 523264   ;;  %s1879_s1 = smov [#allocation16]  }
  0x2a   :  { %179 = vmatpush.bf16.msra.mxu0 %v167_v3  ;;  %238 = vmatpush.msra.mxu2 %v217_v11  ;;  %v2025_v15 = vld [vmem:[#allocation9 + $0x18] sm:$0xff]  ;;  %v2027_v16 = vld [vmem:[#allocation9 + $0x10] sm:$0xff]  ;;  %v2031_v17 = vld [vmem:[#allocation9 + $0x8] sm:$0xff]  ;;  %s1462_s21 = sshll.u32 %s1879_s1, 4  ;;  %s1464_s26 = sshll.u32 %s2432_s17, 4  ;;  %s1463_s21 = int_to_ptr.vmem [resolvable:$true] %s1462_s21  ;;  %s1465_s26 = int_to_ptr.hbm [resolvable:$true] %s1464_s26 }
  0x2b   :  { %281 = vmatpush.msra.mxu3 %v2025_v15  ;;  %v2035_v18 = vld [vmem:[#allocation9] sm:$0xff]  ;;  %vm262_vm4 = vcmp.ge.s32.totalorder %v261_v36, 64  ;;  %vm263_vm5 = vcmp.lt.s32.totalorder %v261_v36, 96  ;;  %v2068_v55 = vld [vmem:[#allocation10 + $0x38] sm:$0xff]  ;;  %v2070_v56 = vld [vmem:[#allocation10 + $0x30] sm:$0xff] }
  0x2c   :  { %239 = vmatpush.msra.mxu2 %v216_v12  ;;  %v1528_v20 = vld [vmem:[%s2418_s3] ss:$0 sm:$0xff]  ;;  %vm2056_vm7 = vmand %vm262_vm4, %vm263_vm5  ;;  %s1877_s3 = smov 64   ;;  %v2074_v57 = vld [vmem:[#allocation10 + $0x28] sm:$0xff] }
  0x2d   :  { %1477 = vmatmul.msk.bf16.vlgmr.msra.gmra.mxu0 %vm168_vm0, %v164_v4  ;;  %282 = vmatpush.msra.mxu3 %v2027_v16  ;;  %v1529_v25 = vld [vmem:[%s2421_s6] ss:$0 sm:$0xff]  ;;  %s1878_s6 = smov 32   ;;  %v2084_v59 = vld [vmem:[#allocation10 + $0x18] sm:$0xff]  ;;  %v2089_v60 = vld [vmem:[#allocation10 + $0x10] sm:$0xff] }
  0x2e   :  { %240 = vmatpush.msra.mxu2 %v215_v13  ;;  %345 = vmatpush.msrb.mxu0 %v2068_v55  ;;  %v2079_v58 = vld [vmem:[#allocation10 + $0x20] sm:$0xff]  ;;  %v2094_v61 = vld [vmem:[#allocation10 + $0x8] sm:$0xff] }
  0x2f   :  { %283 = vmatpush.msra.mxu3 %v2031_v17  ;;  %v2104_v0 = vld [vmem:[#allocation10] sm:$0xff] }
  0x30   :  { %241 = vmatpush.msra.mxu2 %v214_v14  ;;  %346 = vmatpush.msrb.mxu0 %v2070_v56  ;;  %v2143_v3 = vld [vmem:[%s2423_s8] sm:$0x1] }
  0x31   :  { %284 = vmatpush.msra.mxu3 %v2035_v18 }
  0x32   :  { %416 = vmatpush.msrb.mxu2 %v2025_v15  ;;  %285 = vmatmul.f32.vlgmr.msra.gmra.mxu3 %v1876_v19 }
  0x33   :  { %552 = vmatpush.msrb.mxu3 %v2025_v15  ;;  %347 = vmatpush.msrb.mxu0 %v2074_v57 }
  0x34   :  { %417 = vmatpush.msrb.mxu2 %v2027_v16 }
  0x35   :  { %553 = vmatpush.msrb.mxu3 %v2027_v16  ;;  %348 = vmatpush.msrb.mxu0 %v2079_v58 }
  0x36   :  { %418 = vmatpush.msrb.mxu2 %v2031_v17 }
  0x37   :  { %554 = vmatpush.msrb.mxu3 %v2031_v17  ;;  %349 = vmatpush.msrb.mxu0 %v2084_v59 }
  0x38   :  { %419 = vmatpush.msrb.mxu2 %v2035_v18 }
  0x39   :  { %555 = vmatpush.msrb.mxu3 %v2035_v18  ;;  %350 = vmatpush.msrb.mxu0 %v2089_v60 }
  0x3b   :  { %688 = vmatpush.msra.mxu3 %v2025_v15  ;;  %351 = vmatpush.msrb.mxu0 %v2094_v61 }
  0x3d   :  { %689 = vmatpush.msra.mxu3 %v2027_v16  ;;  %352 = vmatpush.msrb.mxu0 %v2104_v0 }
  0x3f   :  { %690 = vmatpush.msra.mxu3 %v2031_v17  ;;  %754 = vmatpush.msra.mxu0 %v2068_v55 }
  0x41   :  { %691 = vmatpush.msra.mxu3 %v2035_v18  ;;  %755 = vmatpush.msra.mxu0 %v2070_v56 }
  0x43   :  { %756 = vmatpush.msra.mxu0 %v2074_v57 }
  0x45   :  { %757 = vmatpush.msra.mxu0 %v2079_v58 }
  0x47   :  { %758 = vmatpush.msra.mxu0 %v2084_v59 }
  0x49   :  { %759 = vmatpush.msra.mxu0 %v2089_v60 }
  0x4b   :  { %760 = vmatpush.msra.mxu0 %v2094_v61 }
  0x4d   :  { %761 = vmatpush.msra.mxu0 %v2104_v0 }
  0xaa   :  { %v181_v5 = vpop.f32.mrf.mxu0 }
  0xab   :  { %v187_v7 = vpack.c.bf16 %v181_v5, %v181_v5 }
  0xad   :  { %v198_v8 = vsel %vm196_vm1, %v187_v7, 0 }
  0xae   :  { %207 = vmatpush.bf16.msra.mxu1 %v198_v8 }
  0xb1   :  { %1478 = vmatmul.msk.bf16.vlgmr.msra.gmra.mxu1 %vm192_vm2, %v186_v9 }
  0xb2   :  { %v183_v10 = vpop.f32.mrf.mxu0  ;;  %482 = vmatpush.msrb.mxu1 %v2068_v55 }
  0xb4   :  { %483 = vmatpush.msrb.mxu1 %v2070_v56 }
  0xb5   :  { %v286_v28 = vpop.f32.mrf.mxu3 }
  0xb6   :  { %484 = vmatpush.msrb.mxu1 %v2074_v57 }
  0xb8   :  { %485 = vmatpush.msrb.mxu1 %v2079_v58 }
  0xba   :  { %486 = vmatpush.msrb.mxu1 %v2084_v59 }
  0xbc   :  { %487 = vmatpush.msrb.mxu1 %v2089_v60 }
  0xbe   :  { %488 = vmatpush.msrb.mxu1 %v2094_v61 }
  0xc0   :  { %489 = vmatpush.msrb.mxu1 %v2104_v0 }
  0xc2   :  { %824 = vmatpush.msra.mxu1 %v2025_v15 }
  0xc4   :  { %825 = vmatpush.msra.mxu1 %v2027_v16 }
  0xc6   :  { %826 = vmatpush.msra.mxu1 %v2031_v17 }
  0xc8   :  { %827 = vmatpush.msra.mxu1 %v2035_v18 }
 0x12e   :  { %v209_v21 = vpop.f32.mrf.mxu1 }
 0x12f   :  { %v210_v22 = vadd.f32 %v1528_v20, %v209_v21 }
 0x131   :  { %1534 = vtanh.f32 %v210_v22 }
 0x136   :  { %v211_v23 = vpop.f32.mrf.mxu1 }
 0x137   :  { %v1535_v24 = vpop.eup %1534 }
 0x138   :  { %1479 = vmatmul.msk.f32.vlgmr.msra.gmra.mxu2 %vm222_vm3, %v1535_v24 }
 0x139   :  { %618 = vmatpush.msra.mxu2 %v2068_v55 }
 0x13b   :  { %619 = vmatpush.msra.mxu2 %v2070_v56 }
 0x13d   :  { %620 = vmatpush.msra.mxu2 %v2074_v57 }
 0x13f   :  { %621 = vmatpush.msra.mxu2 %v2079_v58 }
 0x141   :  { %622 = vmatpush.msra.mxu2 %v2084_v59 }
 0x143   :  { %623 = vmatpush.msra.mxu2 %v2089_v60 }
 0x145   :  { %624 = vmatpush.msra.mxu2 %v2094_v61 }
 0x147   :  { %625 = vmatpush.msra.mxu2 %v2104_v0 }
 0x1bb   :  { %v243_v26 = vpop.f32.mrf.mxu2 }
 0x1bc   :  { %v244_v27 = vadd.f32 %v1529_v25, %v243_v26 }
 0x1be   :  { %246 = vst [vmem:[#allocation2] sm:$0xff] %v244_v27 }
 0x1c5   :  { %v265_v29 = vld [vmem:[#allocation2] sm:$0x1]  ;;  %v401_v7 = vld [vmem:[#allocation2 + $0x1] sm:$0x1] }
 0x1c6   :  { %v289_v30 = vadd.f32 %v286_v28, %v265_v29 }
 0x1c8   :  { %v1480_v31 = vmul.f32 -1.442695, %v289_v30 }
 0x1ca   :  { %1536 = vpow2.f32 %v1480_v31 }
 0x1d0   :  { %v1537_v32 = vpop.eup %1536 }
 0x1d1   :  { %v294_v33 = vadd.f32 1.0, %v1537_v32 }
 0x1d3   :  { %1538 = vrcp.f32 %v294_v33  ;;  %v306_v39 = vand.u32 2147483648, %v294_v33  ;;  %v304_v41 = vand.u32 2147483647, %v294_v33  ;;  %vm300_vm8 = vweird.f32 %v294_v33 }
 0x1d4   :  { %1540 = vtanh.f32 %v289_v30 }
 0x1d5   :  { %v307_v44 = vor.u32 1.1754944e-38, %v306_v39  ;;  %vm305_vm10 = vcmp.eq.f32.partialorder %v304_v41, 8.507059e+37 }
 0x1d9   :  { %v1539_v35 = vpop.eup %1538 }
 0x1da   :  { %v296_v37 = vmul.f32 %v1539_v35, %v294_v33  ;;  %vm301_vm6 = vweird.f32 %v1539_v35  ;;  %v1541_v46 = vpop.eup %1540 }
 0x1db   :  { %vm302_vm9 = vmor %vm300_vm8, %vm301_vm6 }
 0x1dc   :  { %v297_v38 = vsub.f32 1.0, %v296_v37 }
 0x1de   :  { %v298_v40 = vmul.f32 %v1539_v35, %v297_v38 }
 0x1e0   :  { %v299_v43 = vadd.f32 %v1539_v35, %v298_v40 }
 0x1e2   :  { %v303_v45 = vsel %vm302_vm9, %v1539_v35, %v299_v43 }
 0x1e3   :  { %v308_v47 = vsel %vm305_vm10, %v307_v44, %v303_v45 }
 0x1e4   :  { %v310_v48 = vsel %vm2056_vm7, %v1541_v46, %v308_v47 }
 0x1e5   :  { %313 = vrot.lane.b32.xlu0 %v310_v48, %s1877_s3  ;;  %v311_v51 = vmul.f32 0.0, %v310_v48 }
 0x257   :  { %v314_v49 = vpop.permute.xlu0 %313 }
 0x258   :  { %v316_v50 = vmul.f32 %v314_v49, %v310_v48 }
 0x25a   :  { %318 = vrot.lane.b32.xlu0 %v316_v50, %s1878_s6 }
 0x2cc   :  { %v319_v52 = vpop.permute.xlu0 %318 }
 0x2cd   :  { %v2064_v53 = vadd.f32 %v319_v52, %v311_v51 }
 0x2cf   :  { %1542 = vtanh.f32 %v2064_v53 }
 0x2d5   :  { %v1543_v54 = vpop.eup %1542 }
 0x2d6   :  { %324 = vrot.lane.b32.xlu1 %v1543_v54, %s1877_s3 }
 0x348   :  { %v325_v62 = vpop.permute.xlu1 %324 }
 0x349   :  { %v327_v63 = vmul.f32 %v325_v62, %v310_v48 }
 0x34b   :  { %329 = vrot.lane.b32.xlu1 %v327_v63, %s1878_s6 }
 0x3bd   :  { %v330_v1 = vpop.permute.xlu1 %329 }
 0x3be   :  { %v332_v2 = vsel %vm222_vm3, %v330_v1, 0.0  ;;  %1483 = vmatmul.msk.f32.vlgmr.msrb.gmra.mxu2 %vm222_vm3, %v330_v1 }
 0x3bf   :  { %1481 = vmatmul.msk.f32.vlgmr.msrb.gmra.mxu0 %vm333_vm11, %v332_v2  ;;  %1026 = vmatpush.msrb.mxu2 %v2068_v55 }
 0x3c0   :  { %1298 = vmatpush.msrb.mxu0 %v2068_v55 }
 0x3c1   :  { %1027 = vmatpush.msrb.mxu2 %v2070_v56 }
 0x3c2   :  { %1299 = vmatpush.msrb.mxu0 %v2070_v56 }
 0x3c3   :  { %1028 = vmatpush.msrb.mxu2 %v2074_v57 }
 0x3c4   :  { %1300 = vmatpush.msrb.mxu0 %v2074_v57 }
 0x3c5   :  { %1029 = vmatpush.msrb.mxu2 %v2079_v58 }
 0x3c6   :  { %1301 = vmatpush.msrb.mxu0 %v2079_v58 }
 0x3c7   :  { %1030 = vmatpush.msrb.mxu2 %v2084_v59 }
 0x3c8   :  { %1302 = vmatpush.msrb.mxu0 %v2084_v59 }
 0x3c9   :  { %1031 = vmatpush.msrb.mxu2 %v2089_v60 }
 0x3ca   :  { %1303 = vmatpush.msrb.mxu0 %v2089_v60 }
 0x3cb   :  { %1032 = vmatpush.msrb.mxu2 %v2094_v61 }
 0x3cc   :  { %1304 = vmatpush.msrb.mxu0 %v2094_v61 }
 0x3cd   :  { %1033 = vmatpush.msrb.mxu2 %v2104_v0 }
 0x3ce   :  { %1305 = vmatpush.msrb.mxu0 %v2104_v0 }
 0x43c   :  { %v354_v4 = vpop.f32.mrf.mxu0 }
 0x43d   :  { %v355_v5 = vadd.f32 %v354_v4, %v2143_v3 }
 0x43f   :  { %v1482_v6 = vmul.f32 -1.442695, %v355_v5 }
 0x441   :  { %1544 = vpow2.f32 %v1482_v6  ;;  %v421_v8 = vpop.f32.mrf.mxu2 }
 0x442   :  { %v424_v9 = vadd.f32 %v421_v8, %v401_v7  ;;  %v537_v8 = vld [vmem:[#allocation2 + $0x2] sm:$0x1] }
 0x444   :  { %v1484_v10 = vmul.f32 -1.442695, %v424_v9 }
 0x446   :  { %1546 = vpow2.f32 %v1484_v10 }
 0x447   :  { %v1545_v11 = vpop.eup %1544 }
 0x448   :  { %v361_v12 = vadd.f32 1.0, %v1545_v11 }
 0x44a   :  { %1548 = vrcp.f32 %v361_v12  ;;  %v373_v35 = vand.u32 2147483648, %v361_v12  ;;  %vm367_vm2 = vweird.f32 %v361_v12  ;;  %v371_v37 = vand.u32 2147483647, %v361_v12 }
 0x44c   :  { %v1547_v13 = vpop.eup %1546  ;;  %v374_v39 = vor.u32 1.1754944e-38, %v373_v35  ;;  %vm372_vm5 = vcmp.eq.f32.partialorder %v371_v37, 8.507059e+37 }
 0x44d   :  { %v429_v14 = vadd.f32 1.0, %v1547_v13 }
 0x44f   :  { %1550 = vrcp.f32 %v429_v14  ;;  %v441_v25 = vand.u32 2147483648, %v429_v14  ;;  %v439_v27 = vand.u32 2147483647, %v429_v14  ;;  %vm435_vm13 = vweird.f32 %v429_v14 }
 0x450   :  { %v1549_v19 = vpop.eup %1548  ;;  %1552 = vtanh.f32 %v424_v9 }
 0x451   :  { %v363_v20 = vmul.f32 %v1549_v19, %v361_v12  ;;  %v442_v30 = vor.u32 1.1754944e-38, %v441_v25  ;;  %vm440_vm15 = vcmp.eq.f32.partialorder %v439_v27, 8.507059e+37  ;;  %vm368_vm1 = vweird.f32 %v1549_v19 }
 0x452   :  { %1554 = vtanh.f32 %v355_v5  ;;  %vm369_vm4 = vmor %vm367_vm2, %vm368_vm1 }
 0x453   :  { %v364_v23 = vsub.f32 1.0, %v363_v20 }
 0x455   :  { %v1551_v21 = vpop.eup %1550  ;;  %v365_v28 = vmul.f32 %v1549_v19, %v364_v23 }
 0x456   :  { %v431_v22 = vmul.f32 %v1551_v21, %v429_v14  ;;  %vm436_vm12 = vweird.f32 %v1551_v21  ;;  %v1553_v33 = vpop.eup %1552 }
 0x457   :  { %vm437_vm14 = vmor %vm435_vm13, %vm436_vm12  ;;  %v366_v32 = vadd.f32 %v1549_v19, %v365_v28 }
 0x458   :  { %v432_v24 = vsub.f32 1.0, %v431_v22  ;;  %v1555_v41 = vpop.eup %1554 }
 0x459   :  { %v370_v38 = vsel %vm369_vm4, %v1549_v19, %v366_v32 }
 0x45a   :  { %v433_v26 = vmul.f32 %v1551_v21, %v432_v24  ;;  %v375_v40 = vsel %vm372_vm5, %v374_v39, %v370_v38 }
 0x45b   :  { %v377_v43 = vsel %vm2056_vm7, %v1555_v41, %v375_v40 }
 0x45c   :  { %v434_v29 = vadd.f32 %v1551_v21, %v433_v26  ;;  %v378_v51 = vmul.f32 0.0, %v377_v43 }
 0x45e   :  { %v438_v31 = vsel %vm437_vm14, %v1551_v21, %v434_v29 }
 0x45f   :  { %v443_v34 = vsel %vm440_vm15, %v442_v30, %v438_v31 }
 0x460   :  { %v445_v36 = vsel %vm2056_vm7, %v1553_v33, %v443_v34 }
 0x461   :  { %448 = vrot.lane.b32.xlu2 %v445_v36, %s1877_s3  ;;  %v446_v48 = vmul.f32 %v445_v36, %v2064_v53 }
 0x469   :  { %380 = vrot.lane.b32.xlu2 %v377_v43, %s1877_s3 }
 0x4bb   :  { %v449_v44 = vpop.permute.xlu2 %448 }
 0x4bc   :  { %v451_v45 = vmul.f32 %v449_v44, %v445_v36 }
 0x4be   :  { %453 = vrot.lane.b32.xlu0 %v451_v45, %s1878_s6 }
 0x4c3   :  { %v381_v46 = vpop.permute.xlu2 %380 }
 0x4c4   :  { %v383_v47 = vmul.f32 %v381_v46, %v377_v43 }
 0x4c6   :  { %385 = vrot.lane.b32.xlu1 %v383_v47, %s1878_s6 }
 0x530   :  { %v454_v49 = vpop.permute.xlu0 %453 }
 0x531   :  { %v2155_v50 = vadd.f32 %v454_v49, %v446_v48 }
 0x533   :  { %1556 = vtanh.f32 %v2155_v50 }
 0x538   :  { %v386_v52 = vpop.permute.xlu1 %385 }
 0x539   :  { %v1557_v54 = vpop.eup %1556  ;;  %v2158_v62 = vadd.f32 %v386_v52, %v378_v51 }
 0x53a   :  { %459 = vrot.lane.b32.xlu2 %v1557_v54, %s1877_s3 }
 0x53b   :  { %1558 = vtanh.f32 %v2158_v62 }
 0x541   :  { %v1559_v63 = vpop.eup %1558 }
 0x542   :  { %391 = vrot.lane.b32.xlu0 %v1559_v63, %s1877_s3 }
 0x594   :  { %v460_v1 = vpop.permute.xlu2 %459 }
 0x595   :  { %v462_v2 = vmul.f32 %v460_v1, %v445_v36 }
 0x597   :  { %464 = vrot.lane.b32.xlu1 %v462_v2, %s1878_s6 }
 0x5b4   :  { %v392_v53 = vpop.permute.xlu0 %391 }
 0x5b5   :  { %v2164_v4 = vmul.f32 %v392_v53, %v377_v43 }
 0x5b7   :  { %467 = vrot.lane.b32.xlu2 %v2164_v4, %s1877_s3 }
 0x609   :  { %v465_v5 = vpop.permute.xlu1 %464 }
 0x60a   :  { %1487 = vmatmul.msk.f32.vlgmr.msrb.gmra.mxu3 %vm222_vm3, %v465_v5 }
 0x60b   :  { %890 = vmatpush.msrb.mxu3 %v2068_v55 }
 0x60d   :  { %891 = vmatpush.msrb.mxu3 %v2070_v56 }
 0x60f   :  { %892 = vmatpush.msrb.mxu3 %v2074_v57 }
 0x611   :  { %v468_v6 = vpop.permute.xlu2 %467  ;;  %893 = vmatpush.msrb.mxu3 %v2079_v58 }
 0x612   :  { %v470_v7 = vsel %vm222_vm3, %v465_v5, %v468_v6 }
 0x613   :  { %1485 = vmatmul.msk.f32.vlgmr.msrb.gmra.mxu1 %vm333_vm11, %v470_v7  ;;  %894 = vmatpush.msrb.mxu3 %v2084_v59 }
 0x614   :  { %960 = vmatpush.msrb.mxu1 %v2025_v15 }
 0x615   :  { %895 = vmatpush.msrb.mxu3 %v2089_v60 }
 0x616   :  { %961 = vmatpush.msrb.mxu1 %v2027_v16 }
 0x617   :  { %896 = vmatpush.msrb.mxu3 %v2094_v61 }
 0x618   :  { %962 = vmatpush.msrb.mxu1 %v2031_v17 }
 0x619   :  { %897 = vmatpush.msrb.mxu3 %v2104_v0 }
 0x61a   :  { %963 = vmatpush.msrb.mxu1 %v2035_v18 }
 0x68d   :  { %v557_v9 = vpop.f32.mrf.mxu3 }
 0x68e   :  { %v560_v10 = vadd.f32 %v557_v9, %v537_v8 }
 0x690   :  { %v1488_v11 = vmul.f32 -1.442695, %v560_v10  ;;  %v491_v12 = vpop.f32.mrf.mxu1 }
 0x691   :  { %v492_v13 = vadd.f32 %v491_v12, %v2143_v3 }
 0x692   :  { %1560 = vpow2.f32 %v1488_v11 }
 0x693   :  { %v1486_v14 = vmul.f32 -1.442695, %v492_v13 }
 0x695   :  { %1562 = vpow2.f32 %v1486_v14 }
 0x698   :  { %v1561_v19 = vpop.eup %1560 }
 0x699   :  { %v565_v20 = vadd.f32 1.0, %v1561_v19 }
 0x69b   :  { %v1563_v21 = vpop.eup %1562  ;;  %1564 = vrcp.f32 %v565_v20  ;;  %v577_v27 = vand.u32 2147483648, %v565_v20  ;;  %v575_v30 = vand.u32 2147483647, %v565_v20  ;;  %vm571_vm8 = vweird.f32 %v565_v20 }
 0x69c   :  { %v498_v22 = vadd.f32 1.0, %v1563_v21 }
 0x69d   :  { %v578_v34 = vor.u32 1.1754944e-38, %v577_v27  ;;  %vm576_vm12 = vcmp.eq.f32.partialorder %v575_v30, 8.507059e+37 }
 0x69e   :  { %1566 = vrcp.f32 %v498_v22  ;;  %v510_v33 = vand.u32 2147483648, %v498_v22  ;;  %v508_v36 = vand.u32 2147483647, %v498_v22  ;;  %vm504_vm13 = vweird.f32 %v498_v22 }
 0x69f   :  { %1568 = vtanh.f32 %v560_v10 }
 0x6a0   :  { %1570 = vtanh.f32 %v492_v13  ;;  %v511_v43 = vor.u32 1.1754944e-38, %v510_v33  ;;  %vm509_vm15 = vcmp.eq.f32.partialorder %v508_v36, 8.507059e+37  ;;  %v673_v13 = vld [vmem:[#allocation2 + $0x3] sm:$0x1] }
 0x6a1   :  { %v1565_v23 = vpop.eup %1564 }
 0x6a2   :  { %v567_v24 = vmul.f32 %v1565_v23, %v565_v20  ;;  %vm572_vm6 = vweird.f32 %v1565_v23 }
 0x6a3   :  { %vm573_vm9 = vmor %vm571_vm8, %vm572_vm6 }
 0x6a4   :  { %v1567_v25 = vpop.eup %1566  ;;  %v568_v26 = vsub.f32 1.0, %v567_v24 }
 0x6a5   :  { %v500_v28 = vmul.f32 %v1567_v25, %v498_v22  ;;  %vm505_vm10 = vweird.f32 %v1567_v25  ;;  %v1569_v38 = vpop.eup %1568 }
 0x6a6   :  { %v569_v29 = vmul.f32 %v1565_v23, %v568_v26  ;;  %vm506_vm14 = vmor %vm504_vm13, %vm505_vm10  ;;  %v1571_v45 = vpop.eup %1570 }
 0x6a7   :  { %v501_v31 = vsub.f32 1.0, %v500_v28 }
 0x6a8   :  { %v570_v32 = vadd.f32 %v1565_v23, %v569_v29 }
 0x6a9   :  { %v502_v35 = vmul.f32 %v1567_v25, %v501_v31 }
 0x6aa   :  { %v574_v37 = vsel %vm573_vm9, %v1565_v23, %v570_v32 }
 0x6ab   :  { %v579_v39 = vsel %vm576_vm12, %v578_v34, %v574_v37  ;;  %v503_v40 = vadd.f32 %v1567_v25, %v502_v35 }
 0x6ac   :  { %v581_v41 = vsel %vm2056_vm7, %v1569_v38, %v579_v39 }
 0x6ad   :  { %584 = vrot.lane.b32.xlu1 %v581_v41, %s1877_s3  ;;  %v507_v44 = vsel %vm506_vm14, %v1567_v25, %v503_v40  ;;  %v582_v53 = vmul.f32 %v581_v41, %v2155_v50 }
 0x6ae   :  { %v512_v46 = vsel %vm509_vm15, %v511_v43, %v507_v44 }
 0x6af   :  { %v514_v47 = vsel %vm2056_vm7, %v1571_v45, %v512_v46 }
 0x6b0   :  { %517 = vrot.lane.b32.xlu0 %v514_v47, %s1877_s3  ;;  %v515_v54 = vmul.f32 %v514_v47, %v2158_v62 }
 0x71f   :  { %v585_v48 = vpop.permute.xlu1 %584 }
 0x720   :  { %v587_v49 = vmul.f32 %v585_v48, %v581_v41 }
 0x722   :  { %589 = vrot.lane.b32.xlu0 %v587_v49, %s1878_s6  ;;  %v518_v51 = vpop.permute.xlu0 %517 }
 0x723   :  { %v520_v52 = vmul.f32 %v518_v51, %v514_v47 }
 0x725   :  { %522 = vrot.lane.b32.xlu2 %v520_v52, %s1878_s6 }
 0x77f   :  { %v523_v63 = vpop.permute.xlu2 %522 }
 0x780   :  { %v2193_v1 = vadd.f32 %v523_v63, %v515_v54 }
 0x782   :  { %1572 = vtanh.f32 %v2193_v1 }
 0x788   :  { %v1573_v2 = vpop.eup %1572 }
 0x789   :  { %528 = vrot.lane.b32.xlu1 %v1573_v2, %s1877_s3 }
 0x794   :  { %v590_v5 = vpop.permute.xlu0 %589 }
 0x795   :  { %v2198_v6 = vadd.f32 %v590_v5, %v582_v53 }
 0x797   :  { %1574 = vtanh.f32 %v2198_v6 }
 0x79d   :  { %v1575_v7 = vpop.eup %1574 }
 0x79e   :  { %595 = vrot.lane.b32.xlu2 %v1575_v7, %s1877_s3 }
 0x7f8   :  { %v596_v8 = vpop.permute.xlu2 %595 }
 0x7f9   :  { %v598_v62 = vmul.f32 %v596_v8, %v581_v41 }
 0x7fb   :  { %600 = vrot.lane.b32.xlu0 %v598_v62, %s1878_s6  ;;  %v529_v9 = vpop.permute.xlu1 %528 }
 0x7fc   :  { %v2203_v10 = vmul.f32 %v529_v9, %v514_v47 }
 0x7fe   :  { %603 = vrot.lane.b32.xlu1 %v2203_v10, %s1877_s3 }
 0x86d   :  { %v601_v11 = vpop.permute.xlu0 %600 }
 0x86e   :  { %1491 = vmatmul.msk.f32.vlgmr.msra.gmra.mxu3 %vm222_vm3, %v601_v11 }
 0x86f   :  { %1232 = vmatpush.msra.mxu3 %v2025_v15 }
 0x870   :  { %v604_v50 = vpop.permute.xlu1 %603 }
 0x871   :  { %v606_v12 = vsel %vm222_vm3, %v601_v11, %v604_v50  ;;  %1233 = vmatpush.msra.mxu3 %v2027_v16 }
 0x872   :  { %1489 = vmatmul.msk.f32.vlgmr.msra.gmra.mxu2 %vm333_vm11, %v606_v12 }
 0x873   :  { %1096 = vmatpush.msra.mxu2 %v2025_v15  ;;  %1234 = vmatpush.msra.mxu3 %v2031_v17 }
 0x875   :  { %1097 = vmatpush.msra.mxu2 %v2027_v16  ;;  %1235 = vmatpush.msra.mxu3 %v2035_v18 }
 0x877   :  { %1098 = vmatpush.msra.mxu2 %v2031_v17 }
 0x879   :  { %1099 = vmatpush.msra.mxu2 %v2035_v18 }
 0x8f1   :  { %v693_v14 = vpop.f32.mrf.mxu3 }
 0x8f2   :  { %v696_v19 = vadd.f32 %v693_v14, %v673_v13 }
 0x8f4   :  { %v1492_v20 = vmul.f32 -1.442695, %v696_v19 }
 0x8f5   :  { %v627_v21 = vpop.f32.mrf.mxu2 }
 0x8f6   :  { %1576 = vpow2.f32 %v1492_v20  ;;  %v628_v22 = vadd.f32 %v627_v21, %v2143_v3 }
 0x8f8   :  { %v1490_v23 = vmul.f32 -1.442695, %v628_v22 }
 0x8fa   :  { %1578 = vpow2.f32 %v1490_v23 }
 0x8fc   :  { %v1577_v15 = vpop.eup %1576 }
 0x8fd   :  { %v701_v24 = vadd.f32 1.0, %v1577_v15 }
 0x8ff   :  { %1580 = vrcp.f32 %v701_v24  ;;  %v711_v28 = vand.u32 2147483647, %v701_v24  ;;  %v713_v29 = vand.u32 2147483648, %v701_v24  ;;  %vm707_vm2 = vweird.f32 %v701_v24 }
 0x900   :  { %v1579_v16 = vpop.eup %1578 }
 0x901   :  { %v634_v25 = vadd.f32 1.0, %v1579_v16  ;;  %vm712_vm5 = vcmp.eq.f32.partialorder %v711_v28, 8.507059e+37  ;;  %v714_v34 = vor.u32 1.1754944e-38, %v713_v29 }
 0x903   :  { %1582 = vrcp.f32 %v634_v25  ;;  %v646_v35 = vand.u32 2147483648, %v634_v25  ;;  %v644_v38 = vand.u32 2147483647, %v634_v25  ;;  %vm640_vm8 = vweird.f32 %v634_v25 }
 0x904   :  { %1584 = vtanh.f32 %v696_v19 }
 0x905   :  { %v1581_v26 = vpop.eup %1580  ;;  %1586 = vtanh.f32 %v628_v22  ;;  %v647_v44 = vor.u32 1.1754944e-38, %v646_v35  ;;  %vm645_vm10 = vcmp.eq.f32.partialorder %v644_v38, 8.507059e+37 }
 0x906   :  { %v703_v17 = vmul.f32 %v1581_v26, %v701_v24  ;;  %vm708_vm1 = vweird.f32 %v1581_v26 }
 0x907   :  { %vm709_vm4 = vmor %vm707_vm2, %vm708_vm1 }
 0x908   :  { %v704_v27 = vsub.f32 1.0, %v703_v17 }
 0x909   :  { %v1583_v18 = vpop.eup %1582 }
 0x90a   :  { %v705_v30 = vmul.f32 %v1581_v26, %v704_v27  ;;  %v636_v31 = vmul.f32 %v1583_v18, %v634_v25  ;;  %vm641_vm6 = vweird.f32 %v1583_v18  ;;  %v1585_v39 = vpop.eup %1584 }
 0x90b   :  { %vm642_vm9 = vmor %vm640_vm8, %vm641_vm6  ;;  %v1587_v46 = vpop.eup %1586 }
 0x90c   :  { %v706_v32 = vadd.f32 %v1581_v26, %v705_v30  ;;  %v637_v33 = vsub.f32 1.0, %v636_v31 }
 0x90e   :  { %v710_v36 = vsel %vm709_vm4, %v1581_v26, %v706_v32  ;;  %v638_v37 = vmul.f32 %v1583_v18, %v637_v33 }
 0x90f   :  { %v715_v40 = vsel %vm712_vm5, %v714_v34, %v710_v36 }
 0x910   :  { %v717_v41 = vsel %vm2056_vm7, %v1585_v39, %v715_v40  ;;  %v639_v43 = vadd.f32 %v1583_v18, %v638_v37 }
 0x911   :  { %720 = vrot.lane.b32.xlu0 %v717_v41, %s1877_s3  ;;  %v718_v63 = vmul.f32 %v717_v41, %v2198_v6 }
 0x912   :  { %v643_v45 = vsel %vm642_vm9, %v1583_v18, %v639_v43 }
 0x913   :  { %v648_v47 = vsel %vm645_vm10, %v647_v44, %v643_v45 }
 0x914   :  { %v650_v48 = vsel %vm2056_vm7, %v1587_v46, %v648_v47 }
 0x915   :  { %653 = vrot.lane.b32.xlu2 %v650_v48, %s1877_s3  ;;  %v651_v5 = vmul.f32 %v650_v48, %v2193_v1 }
 0x96f   :  { %v654_v49 = vpop.permute.xlu2 %653 }
 0x970   :  { %v656_v51 = vmul.f32 %v654_v49, %v650_v48 }
 0x972   :  { %658 = vrot.lane.b32.xlu1 %v656_v51, %s1878_s6 }
 0x983   :  { %v721_v52 = vpop.permute.xlu0 %720 }
 0x984   :  { %v723_v54 = vmul.f32 %v721_v52, %v717_v41 }
 0x986   :  { %725 = vrot.lane.b32.xlu2 %v723_v54, %s1878_s6 }
 0x9e0   :  { %v726_v2 = vpop.permute.xlu2 %725 }
 0x9e1   :  { %v2228_v53 = vadd.f32 %v726_v2, %v718_v63 }
 0x9e3   :  { %1588 = vtanh.f32 %v2228_v53 }
 0x9e4   :  { %v659_v7 = vpop.permute.xlu1 %658 }
 0x9e5   :  { %v2232_v8 = vadd.f32 %v659_v7, %v651_v5 }
 0x9e7   :  { %1590 = vtanh.f32 %v2232_v8 }
 0x9e9   :  { %v1589_v62 = vpop.eup %1588 }
 0x9ea   :  { %731 = vrot.lane.b32.xlu1 %v1589_v62, %s1877_s3 }
 0x9ed   :  { %v1591_v9 = vpop.eup %1590 }
 0x9ee   :  { %664 = vrot.lane.b32.xlu0 %v1591_v9, %s1877_s3 }
 0xa5c   :  { %v732_v11 = vpop.permute.xlu1 %731 }
 0xa5d   :  { %v734_v6 = vmul.f32 %v732_v11, %v717_v41 }
 0xa5f   :  { %736 = vrot.lane.b32.xlu2 %v734_v6, %s1878_s6  ;;  %v945_v6 = vld [vmem:[#allocation2 + $0x5] sm:$0x1] }
 0xa60   :  { %v665_v50 = vpop.permute.xlu0 %664 }
 0xa61   :  { %v2238_v12 = vmul.f32 %v665_v50, %v650_v48 }
 0xa63   :  { %739 = vrot.lane.b32.xlu0 %v2238_v12, %s1877_s3 }
 0xab9   :  { %v737_v1 = vpop.permute.xlu2 %736 }
 0xaba   :  { %1495 = vmatmul.msk.f32.vlgmr.msra.gmra.mxu1 %vm222_vm3, %v737_v1 }
 0xabb   :  { %1162 = vmatpush.msra.mxu1 %v2068_v55  ;;  %v809_v55 = vld [vmem:[#allocation2 + $0x4] sm:$0x1] }
 0xabd   :  { %1163 = vmatpush.msra.mxu1 %v2070_v56 }
 0xabf   :  { %1164 = vmatpush.msra.mxu1 %v2074_v57 }
 0xac1   :  { %1165 = vmatpush.msra.mxu1 %v2079_v58 }
 0xac3   :  { %1166 = vmatpush.msra.mxu1 %v2084_v59 }
 0xac5   :  { %1167 = vmatpush.msra.mxu1 %v2089_v60 }
 0xac7   :  { %1168 = vmatpush.msra.mxu1 %v2094_v61 }
 0xac9   :  { %1169 = vmatpush.msra.mxu1 %v2104_v0 }
 0xad5   :  { %v740_v13 = vpop.permute.xlu0 %739 }
 0xad6   :  { %v742_v14 = vsel %vm222_vm3, %v737_v1, %v740_v13 }
 0xad7   :  { %1493 = vmatmul.msk.f32.vlgmr.msra.gmra.mxu0 %vm333_vm11, %v742_v14 }
 0xb37   :  { %v829_v19 = vpop.f32.mrf.mxu1 }
 0xb38   :  { %v832_v56 = vadd.f32 %v829_v19, %v809_v55 }
 0xb3a   :  { %v1496_v20 = vmul.f32 -1.442695, %v832_v56 }
 0xb3c   :  { %1592 = vpow2.f32 %v1496_v20 }
 0xb42   :  { %v1593_v57 = vpop.eup %1592 }
 0xb43   :  { %v837_v58 = vadd.f32 1.0, %v1593_v57 }
 0xb45   :  { %1594 = vrcp.f32 %v837_v58  ;;  %v849_v61 = vand.u32 2147483648, %v837_v58  ;;  %v847_v0 = vand.u32 2147483647, %v837_v58  ;;  %vm843_vm13 = vweird.f32 %v837_v58 }
 0xb46   :  { %1596 = vtanh.f32 %v832_v56 }
 0xb47   :  { %v850_v15 = vor.u32 1.1754944e-38, %v849_v61  ;;  %vm848_vm15 = vcmp.eq.f32.partialorder %v847_v0, 8.507059e+37 }
 0xb4b   :  { %v1595_v59 = vpop.eup %1594 }
 0xb4c   :  { %v839_v21 = vmul.f32 %v1595_v59, %v837_v58  ;;  %vm844_vm12 = vweird.f32 %v1595_v59  ;;  %v1597_v25 = vpop.eup %1596 }
 0xb4d   :  { %vm845_vm14 = vmor %vm843_vm13, %vm844_vm12 }
 0xb4e   :  { %v840_v60 = vsub.f32 1.0, %v839_v21 }
 0xb50   :  { %v841_v22 = vmul.f32 %v1595_v59, %v840_v60 }
 0xb52   :  { %v842_v23 = vadd.f32 %v1595_v59, %v841_v22 }
 0xb54   :  { %v763_v24 = vpop.f32.mrf.mxu0  ;;  %v846_v16 = vsel %vm845_vm14, %v1595_v59, %v842_v23 }
 0xb55   :  { %v764_v26 = vadd.f32 %v763_v24, %v2143_v3  ;;  %v851_v17 = vsel %vm848_vm15, %v850_v15, %v846_v16 }
 0xb56   :  { %v853_v27 = vsel %vm2056_vm7, %v1597_v25, %v851_v17 }
 0xb57   :  { %v1494_v18 = vmul.f32 -1.442695, %v764_v26  ;;  %856 = vrot.lane.b32.xlu2 %v853_v27, %s1877_s3  ;;  %v854_v47 = vmul.f32 %v853_v27, %v2228_v53 }
 0xb59   :  { %1598 = vpow2.f32 %v1494_v18 }
 0xb5f   :  { %v1599_v28 = vpop.eup %1598 }
 0xb60   :  { %v770_v29 = vadd.f32 1.0, %v1599_v28 }
 0xb62   :  { %1600 = vrcp.f32 %v770_v29  ;;  %v782_v33 = vand.u32 2147483648, %v770_v29  ;;  %v780_v35 = vand.u32 2147483647, %v770_v29  ;;  %vm776_vm2 = vweird.f32 %v770_v29 }
 0xb63   :  { %1602 = vtanh.f32 %v764_v26 }
 0xb64   :  { %v783_v37 = vor.u32 1.1754944e-38, %v782_v33  ;;  %vm781_vm5 = vcmp.eq.f32.partialorder %v780_v35, 8.507059e+37 }
 0xb68   :  { %v1601_v30 = vpop.eup %1600 }
 0xb69   :  { %v772_v31 = vmul.f32 %v1601_v30, %v770_v29  ;;  %vm777_vm1 = vweird.f32 %v1601_v30  ;;  %v1603_v39 = vpop.eup %1602 }
 0xb6a   :  { %vm778_vm4 = vmor %vm776_vm2, %vm777_vm1 }
 0xb6b   :  { %v773_v32 = vsub.f32 1.0, %v772_v31 }
 0xb6d   :  { %v774_v34 = vmul.f32 %v1601_v30, %v773_v32 }
 0xb6f   :  { %v775_v36 = vadd.f32 %v1601_v30, %v774_v34 }
 0xb71   :  { %v779_v38 = vsel %vm778_vm4, %v1601_v30, %v775_v36 }
 0xb72   :  { %v784_v40 = vsel %vm781_vm5, %v783_v37, %v779_v38 }
 0xb73   :  { %v786_v41 = vsel %vm2056_vm7, %v1603_v39, %v784_v40 }
 0xb74   :  { %789 = vrot.lane.b32.xlu1 %v786_v41, %s1877_s3  ;;  %v787_v52 = vmul.f32 %v786_v41, %v2232_v8 }
 0xbb1   :  { %v857_v43 = vpop.permute.xlu2 %856 }
 0xbb2   :  { %v859_v44 = vmul.f32 %v857_v43, %v853_v27 }
 0xbb4   :  { %861 = vrot.lane.b32.xlu1 %v859_v44, %s1878_s6 }
 0xbe6   :  { %v790_v45 = vpop.permute.xlu1 %789 }
 0xbe7   :  { %v792_v46 = vmul.f32 %v790_v45, %v786_v41 }
 0xbe9   :  { %794 = vrot.lane.b32.xlu0 %v792_v46, %s1878_s6 }
 0xc26   :  { %v862_v48 = vpop.permute.xlu1 %861 }
 0xc27   :  { %v2263_v49 = vadd.f32 %v862_v48, %v854_v47 }
 0xc29   :  { %1604 = vtanh.f32 %v2263_v49 }
 0xc2f   :  { %v1605_v51 = vpop.eup %1604 }
 0xc30   :  { %867 = vrot.lane.b32.xlu0 %v1605_v51, %s1877_s3 }
 0xc5b   :  { %v795_v54 = vpop.permute.xlu0 %794 }
 0xc5c   :  { %v2268_v63 = vadd.f32 %v795_v54, %v787_v52 }
 0xc5e   :  { %1606 = vtanh.f32 %v2268_v63 }
 0xc64   :  { %v1607_v2 = vpop.eup %1606 }
 0xc65   :  { %800 = vrot.lane.b32.xlu2 %v1607_v2, %s1877_s3 }
 0xca2   :  { %v868_v5 = vpop.permute.xlu0 %867 }
 0xca3   :  { %v870_v53 = vmul.f32 %v868_v5, %v853_v27 }
 0xca5   :  { %872 = vrot.lane.b32.xlu1 %v870_v53, %s1878_s6 }
 0xcbf   :  { %v801_v7 = vpop.permute.xlu2 %800 }
 0xcc0   :  { %v2273_v62 = vmul.f32 %v801_v7, %v786_v41 }
 0xcc2   :  { %875 = vrot.lane.b32.xlu2 %v2273_v62, %s1877_s3 }
 0xd17   :  { %v873_v9 = vpop.permute.xlu1 %872 }
 0xd18   :  { %1499 = vmatmul.msk.f32.vlgmr.msrb.gmra.mxu1 %vm222_vm3, %v873_v9 }
 0xd1c   :  { %v876_v8 = vpop.permute.xlu2 %875 }
 0xd1d   :  { %v878_v11 = vsel %vm222_vm3, %v873_v9, %v876_v8 }
 0xd1e   :  { %1497 = vmatmul.msk.f32.vlgmr.msrb.gmra.mxu3 %vm333_vm11, %v878_v11  ;;  %v1081_v11 = vld [vmem:[#allocation2 + $0x6] sm:$0x1] }
 0xd95   :  { %v965_v50 = vpop.f32.mrf.mxu1 }
 0xd96   :  { %v968_v1 = vadd.f32 %v965_v50, %v945_v6 }
 0xd98   :  { %v1500_v13 = vmul.f32 -1.442695, %v968_v1 }
 0xd9a   :  { %1608 = vpow2.f32 %v1500_v13 }
 0xda0   :  { %v1609_v14 = vpop.eup %1608 }
 0xda1   :  { %v973_v55 = vadd.f32 1.0, %v1609_v14  ;;  %v899_v19 = vpop.f32.mrf.mxu3 }
 0xda2   :  { %v900_v56 = vadd.f32 %v899_v19, %v2143_v3 }
 0xda3   :  { %1610 = vrcp.f32 %v973_v55  ;;  %v985_v61 = vand.u32 2147483648, %v973_v55  ;;  %v983_v0 = vand.u32 2147483647, %v973_v55  ;;  %vm979_vm8 = vweird.f32 %v973_v55 }
 0xda4   :  { %v1498_v20 = vmul.f32 -1.442695, %v900_v56 }
 0xda5   :  { %v986_v15 = vor.u32 1.1754944e-38, %v985_v61  ;;  %vm984_vm10 = vcmp.eq.f32.partialorder %v983_v0, 8.507059e+37 }
 0xda6   :  { %1612 = vpow2.f32 %v1498_v20 }
 0xda7   :  { %1614 = vtanh.f32 %v968_v1 }
 0xda9   :  { %v1611_v57 = vpop.eup %1610 }
 0xdaa   :  { %v975_v58 = vmul.f32 %v1611_v57, %v973_v55  ;;  %vm980_vm6 = vweird.f32 %v1611_v57 }
 0xdab   :  { %vm981_vm9 = vmor %vm979_vm8, %vm980_vm6 }
 0xdac   :  { %v1613_v59 = vpop.eup %1612  ;;  %v976_v21 = vsub.f32 1.0, %v975_v58 }
 0xdad   :  { %v906_v60 = vadd.f32 1.0, %v1613_v59  ;;  %v1615_v16 = vpop.eup %1614 }
 0xdae   :  { %v977_v22 = vmul.f32 %v1611_v57, %v976_v21 }
 0xdaf   :  { %1616 = vrcp.f32 %v906_v60  ;;  %v918_v28 = vand.u32 2147483648, %v906_v60  ;;  %v916_v30 = vand.u32 2147483647, %v906_v60  ;;  %vm912_vm13 = vweird.f32 %v906_v60 }
 0xdb0   :  { %v978_v23 = vadd.f32 %v1611_v57, %v977_v22  ;;  %1618 = vtanh.f32 %v900_v56 }
 0xdb1   :  { %v919_v32 = vor.u32 1.1754944e-38, %v918_v28  ;;  %vm917_vm15 = vcmp.eq.f32.partialorder %v916_v30, 8.507059e+37 }
 0xdb2   :  { %v982_v24 = vsel %vm981_vm9, %v1611_v57, %v978_v23 }
 0xdb3   :  { %v987_v25 = vsel %vm984_vm10, %v986_v15, %v982_v24 }
 0xdb4   :  { %v989_v26 = vsel %vm2056_vm7, %v1615_v16, %v987_v25 }
 0xdb5   :  { %v1617_v17 = vpop.eup %1616  ;;  %992 = vrot.lane.b32.xlu1 %v989_v26, %s1877_s3  ;;  %v990_v46 = vmul.f32 %v989_v26, %v2263_v49 }
 0xdb6   :  { %v908_v27 = vmul.f32 %v1617_v17, %v906_v60  ;;  %vm913_vm12 = vweird.f32 %v1617_v17  ;;  %v1619_v34 = vpop.eup %1618 }
 0xdb7   :  { %vm914_vm14 = vmor %vm912_vm13, %vm913_vm12 }
 0xdb8   :  { %v909_v18 = vsub.f32 1.0, %v908_v27 }
 0xdba   :  { %v910_v29 = vmul.f32 %v1617_v17, %v909_v18 }
 0xdbc   :  { %v911_v31 = vadd.f32 %v1617_v17, %v910_v29 }
 0xdbe   :  { %v915_v33 = vsel %vm914_vm14, %v1617_v17, %v911_v31 }
 0xdbf   :  { %v920_v35 = vsel %vm917_vm15, %v919_v32, %v915_v33 }
 0xdc0   :  { %v922_v36 = vsel %vm2056_vm7, %v1619_v34, %v920_v35 }
 0xdc1   :  { %925 = vrot.lane.b32.xlu0 %v922_v36, %s1877_s3  ;;  %v923_v41 = vmul.f32 %v922_v36, %v2268_v63 }
 0xe27   :  { %v993_v37 = vpop.permute.xlu1 %992 }
 0xe28   :  { %v995_v38 = vmul.f32 %v993_v37, %v989_v26 }
 0xe2a   :  { %997 = vrot.lane.b32.xlu0 %v995_v38, %s1878_s6 }
 0xe33   :  { %v926_v39 = vpop.permute.xlu0 %925 }
 0xe34   :  { %v928_v40 = vmul.f32 %v926_v39, %v922_v36 }
 0xe36   :  { %930 = vrot.lane.b32.xlu2 %v928_v40, %s1878_s6 }
 0xe90   :  { %v931_v43 = vpop.permute.xlu2 %930 }
 0xe91   :  { %v2290_v44 = vadd.f32 %v931_v43, %v923_v41 }
 0xe93   :  { %1620 = vtanh.f32 %v2290_v44 }
 0xe99   :  { %v1621_v45 = vpop.eup %1620 }
 0xe9a   :  { %936 = vrot.lane.b32.xlu1 %v1621_v45, %s1877_s3 }
 0xe9c   :  { %v998_v47 = vpop.permute.xlu0 %997 }
 0xe9d   :  { %v2295_v48 = vadd.f32 %v998_v47, %v990_v46 }
 0xe9f   :  { %1622 = vtanh.f32 %v2295_v48 }
 0xea5   :  { %v1623_v51 = vpop.eup %1622 }
 0xea6   :  { %1003 = vrot.lane.b32.xlu2 %v1623_v51, %s1877_s3 }
 0xf00   :  { %v1004_v52 = vpop.permute.xlu2 %1003 }
 0xf01   :  { %v1006_v54 = vmul.f32 %v1004_v52, %v989_v26 }
 0xf03   :  { %1008 = vrot.lane.b32.xlu0 %v1006_v54, %s1878_s6 }
 0xf0c   :  { %v937_v63 = vpop.permute.xlu1 %936 }
 0xf0d   :  { %v2300_v2 = vmul.f32 %v937_v63, %v922_v36  ;;  %v1217_v63 = vld [vmem:[#allocation2 + $0x7] sm:$0x1] }
 0xf0f   :  { %1011 = vrot.lane.b32.xlu1 %v2300_v2, %s1877_s3 }
 0xf75   :  { %v1009_v5 = vpop.permute.xlu0 %1008 }
 0xf81   :  { %v1012_v49 = vpop.permute.xlu1 %1011 }
 0xf82   :  { %v1014_v53 = vsel %vm222_vm3, %v1009_v5, %v1012_v49 }
 0xf83   :  { %1501 = vmatmul.msk.f32.vlgmr.msrb.gmra.mxu2 %vm333_vm11, %v1014_v53 }
 0xf8b   :  { %1503 = vmatmul.msk.f32.vlgmr.msra.gmra.mxu2 %vm222_vm3, %v1009_v5 }
0x1006   :  { %v1035_v7 = vpop.f32.mrf.mxu2 }
0x1007   :  { %v1036_v9 = vadd.f32 %v1035_v7, %v2143_v3 }
0x1009   :  { %v1502_v8 = vmul.f32 -1.442695, %v1036_v9 }
0x100b   :  { %1624 = vpow2.f32 %v1502_v8 }
0x100e   :  { %v1101_v6 = vpop.f32.mrf.mxu2 }
0x100f   :  { %v1104_v50 = vadd.f32 %v1101_v6, %v1081_v11  ;;  %v2337_v11 = vld [vmem:[%s2423_s8] sm:$0x1] }
0x1011   :  { %v1625_v1 = vpop.eup %1624  ;;  %v1504_v13 = vmul.f32 -1.442695, %v1104_v50 }
0x1012   :  { %v1042_v14 = vadd.f32 1.0, %v1625_v1 }
0x1013   :  { %1626 = vpow2.f32 %v1504_v13 }
0x1014   :  { %1628 = vrcp.f32 %v1042_v14  ;;  %v1054_v58 = vand.u32 2147483648, %v1042_v14  ;;  %v1052_v3 = vand.u32 2147483647, %v1042_v14  ;;  %vm1048_vm2 = vweird.f32 %v1042_v14 }
0x1016   :  { %v1055_v61 = vor.u32 1.1754944e-38, %v1054_v58  ;;  %vm1053_vm5 = vcmp.eq.f32.partialorder %v1052_v3, 8.507059e+37 }
0x1019   :  { %v1627_v55 = vpop.eup %1626 }
0x101a   :  { %v1629_v19 = vpop.eup %1628  ;;  %v1109_v56 = vadd.f32 1.0, %v1627_v55 }
0x101b   :  { %v1044_v20 = vmul.f32 %v1629_v19, %v1042_v14  ;;  %vm1049_vm1 = vweird.f32 %v1629_v19 }
0x101c   :  { %1630 = vrcp.f32 %v1109_v56  ;;  %vm1050_vm4 = vmor %vm1048_vm2, %vm1049_vm1  ;;  %v1121_v25 = vand.u32 2147483648, %v1109_v56  ;;  %v1119_v17 = vand.u32 2147483647, %v1109_v56  ;;  %vm1115_vm8 = vweird.f32 %v1109_v56 }
0x101d   :  { %v1045_v57 = vsub.f32 1.0, %v1044_v20  ;;  %1632 = vtanh.f32 %v1036_v9 }
0x101e   :  { %1634 = vtanh.f32 %v1104_v50  ;;  %v1122_v18 = vor.u32 1.1754944e-38, %v1121_v25  ;;  %vm1120_vm10 = vcmp.eq.f32.partialorder %v1119_v17, 8.507059e+37 }
0x101f   :  { %v1046_v59 = vmul.f32 %v1629_v19, %v1045_v57 }
0x1021   :  { %v1047_v21 = vadd.f32 %v1629_v19, %v1046_v59 }
0x1022   :  { %v1631_v60 = vpop.eup %1630 }
0x1023   :  { %v1051_v22 = vsel %vm1050_vm4, %v1629_v19, %v1047_v21  ;;  %v1111_v0 = vmul.f32 %v1631_v60, %v1109_v56  ;;  %v1633_v23 = vpop.eup %1632  ;;  %vm1116_vm6 = vweird.f32 %v1631_v60 }
0x1024   :  { %v1056_v15 = vsel %vm1053_vm5, %v1055_v61, %v1051_v22  ;;  %vm1117_vm9 = vmor %vm1115_vm8, %vm1116_vm6  ;;  %v1635_v29 = vpop.eup %1634 }
0x1025   :  { %v1058_v24 = vsel %vm2056_vm7, %v1633_v23, %v1056_v15  ;;  %v1112_v16 = vsub.f32 1.0, %v1111_v0 }
0x1026   :  { %1061 = vrot.lane.b32.xlu0 %v1058_v24, %s1877_s3  ;;  %v1059_v36 = vmul.f32 %v1058_v24, %v2290_v44 }
0x1027   :  { %v1113_v26 = vmul.f32 %v1631_v60, %v1112_v16 }
0x1029   :  { %v1114_v27 = vadd.f32 %v1631_v60, %v1113_v26 }
0x102b   :  { %v1118_v28 = vsel %vm1117_vm9, %v1631_v60, %v1114_v27 }
0x102c   :  { %v1123_v30 = vsel %vm1120_vm10, %v1122_v18, %v1118_v28  ;;  %vm399_vm10 = vcmask 253952  }
0x102d   :  { %v1125_v31 = vsel %vm2056_vm7, %v1635_v29, %v1123_v30 }
0x102e   :  { %1128 = vrot.lane.b32.xlu2 %v1125_v31, %s1877_s3  ;;  %v1126_v39 = vmul.f32 %v1125_v31, %v2295_v48 }
0x1088   :  { %v1129_v32 = vpop.permute.xlu2 %1128 }
0x1089   :  { %v1131_v33 = vmul.f32 %v1129_v32, %v1125_v31 }
0x108b   :  { %1133 = vrot.lane.b32.xlu1 %v1131_v33, %s1878_s6 }
0x1098   :  { %v1062_v34 = vpop.permute.xlu0 %1061 }
0x1099   :  { %v1064_v35 = vmul.f32 %v1062_v34, %v1058_v24 }
0x109b   :  { %1066 = vrot.lane.b32.xlu2 %v1064_v35, %s1878_s6 }
0x10f5   :  { %v1067_v37 = vpop.permute.xlu2 %1066 }
0x10f6   :  { %v2317_v38 = vadd.f32 %v1067_v37, %v1059_v36 }
0x10f8   :  { %1636 = vtanh.f32 %v2317_v38 }
0x10fd   :  { %v1134_v40 = vpop.permute.xlu1 %1133 }
0x10fe   :  { %v1637_v41 = vpop.eup %1636  ;;  %v2321_v43 = vadd.f32 %v1134_v40, %v1126_v39 }
0x10ff   :  { %1072 = vrot.lane.b32.xlu1 %v1637_v41, %s1877_s3 }
0x1100   :  { %1638 = vtanh.f32 %v2321_v43 }
0x1106   :  { %v1639_v45 = vpop.eup %1638 }
0x1107   :  { %1139 = vrot.lane.b32.xlu0 %v1639_v45, %s1877_s3 }
0x1171   :  { %v1073_v46 = vpop.permute.xlu1 %1072 }
0x1172   :  { %v2326_v44 = vmul.f32 %v1073_v46, %v1058_v24 }
0x1174   :  { %1147 = vrot.lane.b32.xlu0 %v2326_v44, %s1877_s3 }
0x1179   :  { %v1140_v47 = vpop.permute.xlu0 %1139 }
0x117a   :  { %v1142_v51 = vmul.f32 %v1140_v47, %v1125_v31 }
0x117c   :  { %1144 = vrot.lane.b32.xlu2 %v1142_v51, %s1878_s6 }
0x11d6   :  { %v1145_v48 = vpop.permute.xlu2 %1144 }
0x11d7   :  { %1507 = vmatmul.msk.f32.vlgmr.msra.gmra.mxu3 %vm222_vm3, %v1145_v48 }
0x11e6   :  { %v1148_v52 = vpop.permute.xlu0 %1147 }
0x11e7   :  { %v1150_v54 = vsel %vm222_vm3, %v1145_v48, %v1148_v52 }
0x11e8   :  { %1505 = vmatmul.msk.f32.vlgmr.msra.gmra.mxu1 %vm333_vm11, %v1150_v54 }
0x125a   :  { %v1237_v5 = vpop.f32.mrf.mxu3 }
0x125b   :  { %v1240_v49 = vadd.f32 %v1237_v5, %v1217_v63 }
0x125d   :  { %v1508_v53 = vmul.f32 -1.442695, %v1240_v49 }
0x125f   :  { %1640 = vpow2.f32 %v1508_v53 }
0x1265   :  { %v1641_v7 = vpop.eup %1640  ;;  %v1171_v9 = vpop.f32.mrf.mxu1 }
0x1266   :  { %v1245_v8 = vadd.f32 1.0, %v1641_v7  ;;  %v1172_v6 = vadd.f32 %v2337_v11, %v1171_v9 }
0x1268   :  { %1642 = vrcp.f32 %v1245_v8  ;;  %v1506_v50 = vmul.f32 -1.442695, %v1172_v6  ;;  %v1257_v56 = vand.u32 2147483648, %v1245_v8  ;;  %v1255_v57 = vand.u32 2147483647, %v1245_v8 }
0x1269   :  { %vm1251_vm13 = vweird.f32 %v1245_v8 }
0x126a   :  { %1644 = vpow2.f32 %v1506_v50  ;;  %v1258_v59 = vor.u32 1.1754944e-38, %v1257_v56  ;;  %vm1256_vm15 = vcmp.eq.f32.partialorder %v1255_v57, 8.507059e+37 }
0x126b   :  { %1646 = vtanh.f32 %v1240_v49 }
0x126e   :  { %v1643_v1 = vpop.eup %1642 }
0x126f   :  { %v1247_v13 = vmul.f32 %v1643_v1, %v1245_v8  ;;  %vm1252_vm12 = vweird.f32 %v1643_v1 }
0x1270   :  { %v1645_v14 = vpop.eup %1644  ;;  %vm1253_vm14 = vmor %vm1251_vm13, %vm1252_vm12 }
0x1271   :  { %v1178_v55 = vadd.f32 1.0, %v1645_v14  ;;  %v1248_v19 = vsub.f32 1.0, %v1247_v13  ;;  %v1647_v21 = vpop.eup %1646 }
0x1273   :  { %1648 = vrcp.f32 %v1178_v55  ;;  %v1249_v20 = vmul.f32 %v1643_v1, %v1248_v19  ;;  %v1190_v15 = vand.u32 2147483648, %v1178_v55  ;;  %v1188_v16 = vand.u32 2147483647, %v1178_v55 }
0x1274   :  { %1650 = vtanh.f32 %v1172_v6  ;;  %vm1184_vm2 = vweird.f32 %v1178_v55 }
0x1275   :  { %v1250_v58 = vadd.f32 %v1643_v1, %v1249_v20  ;;  %v1191_v26 = vor.u32 1.1754944e-38, %v1190_v15  ;;  %vm1189_vm5 = vcmp.eq.f32.partialorder %v1188_v16, 8.507059e+37  ;;  %v1356_v15 = vld [vmem:[%s2424_s9 + $0x8] sm:$0xff]  ;;  %v1383_v16 = vld [vmem:[#allocation12] sm:$0xff] }
0x1277   :  { %v1254_v3 = vsel %vm1253_vm14, %v1643_v1, %v1250_v58 }
0x1278   :  { %v1259_v60 = vsel %vm1256_vm15, %v1258_v59, %v1254_v3 }
0x1279   :  { %v1649_v61 = vpop.eup %1648  ;;  %v1261_v22 = vsel %vm2056_vm7, %v1647_v21, %v1259_v60 }
0x127a   :  { %1264 = vrot.lane.b32.xlu2 %v1261_v22, %s1877_s3  ;;  %v1180_v0 = vmul.f32 %v1649_v61, %v1178_v55  ;;  %vm1185_vm1 = vweird.f32 %v1649_v61  ;;  %v1651_v27 = vpop.eup %1650  ;;  %v1262_v33 = vmul.f32 %v1261_v22, %v2321_v43 }
0x127b   :  { %vm1186_vm4 = vmor %vm1184_vm2, %vm1185_vm1 }
0x127c   :  { %v1181_v23 = vsub.f32 1.0, %v1180_v0  ;;  %v1357_v0 = vld [vmem:[%s2424_s9 + $0x10] sm:$0xff] }
0x127e   :  { %v1182_v24 = vmul.f32 %v1649_v61, %v1181_v23 }
0x1280   :  { %v1183_v25 = vadd.f32 %v1649_v61, %v1182_v24 }
0x1282   :  { %v1187_v17 = vsel %vm1186_vm4, %v1649_v61, %v1183_v25  ;;  %v1384_v25 = vld [vmem:[#allocation12 + $0x8] sm:$0xff] }
0x1283   :  { %v1192_v18 = vsel %vm1189_vm5, %v1191_v26, %v1187_v17  ;;  %v1385_v26 = vpack.c.bf16 %v1384_v25, %v1383_v16 }
0x1284   :  { %v1194_v28 = vsel %vm2056_vm7, %v1651_v27, %v1192_v18 }
0x1285   :  { %1197 = vrot.lane.b32.xlu1 %v1194_v28, %s1877_s3  ;;  %v1195_v37 = vmul.f32 %v1194_v28, %v2317_v38  ;;  %1400 = vmatpush.bf16.msrb.mxu3 %v1385_v26 }
0x12d4   :  { %v1265_v29 = vpop.permute.xlu2 %1264 }
0x12d5   :  { %v1267_v30 = vmul.f32 %v1265_v29, %v1261_v22  ;;  %v1409_v29 = vld [vmem:[#allocation13 + $0x8] sm:$0xff] }
0x12d7   :  { %1269 = vrot.lane.b32.xlu1 %v1267_v30, %s1878_s6 }
0x12f7   :  { %v1198_v31 = vpop.permute.xlu1 %1197 }
0x12f8   :  { %v1200_v32 = vmul.f32 %v1198_v31, %v1194_v28  ;;  %v1530_v31 = vld [vmem:[%s2425_s10] ss:$0 sm:$0xff] }
0x12fa   :  { %1202 = vrot.lane.b32.xlu0 %v1200_v32, %s1878_s6 }
0x1349   :  { %v1270_v34 = vpop.permute.xlu1 %1269 }
0x134a   :  { %v1272_v35 = vadd.f32 %v1270_v34, %v1262_v33 }
0x134c   :  { %1652 = vtanh.f32 %v1272_v35 }
0x1352   :  { %v1653_v36 = vpop.eup %1652 }
0x1353   :  { %1275 = vrot.lane.b32.xlu0 %v1653_v36, %s1877_s3 }
0x136c   :  { %v1203_v39 = vpop.permute.xlu0 %1202 }
0x136d   :  { %v1205_v40 = vadd.f32 %v1203_v39, %v1195_v37  ;;  %v1433_v37 = vld [vmem:[#allocation15] sm:$0xff]  ;;  %v1434_v39 = vld [vmem:[#allocation15 + $0x8] sm:$0xff] }
0x136f   :  { %1654 = vtanh.f32 %v1205_v40 }
0x1375   :  { %v1655_v41 = vpop.eup %1654 }
0x1376   :  { %1208 = vrot.lane.b32.xlu2 %v1655_v41, %s1877_s3  ;;  %v1531_v41 = vld [vmem:[%s2427_s12] ss:$0 sm:$0xff] }
0x13c5   :  { %v1276_v45 = vpop.permute.xlu0 %1275 }
0x13c6   :  { %v1278_v46 = vmul.f32 %v1276_v45, %v1261_v22 }
0x13c8   :  { %1280 = vrot.lane.b32.xlu1 %v1278_v46, %s1878_s6 }
0x13d0   :  { %v1209_v47 = vpop.permute.xlu2 %1208 }
0x13d1   :  { %v1211_v43 = vmul.f32 %v1209_v47, %v1194_v28  ;;  %v1408_v28 = vld [vmem:[#allocation13] sm:$0xff] }
0x13d2   :  { %v1410_v30 = vpack.c.bf16 %v1409_v29, %v1408_v28 }
0x13d3   :  { %1283 = vrot.lane.b32.xlu2 %v1211_v43, %s1877_s3 }
0x13d4   :  { %1425 = vmatpush.bf16.msrb.mxu1 %v1410_v30 }
0x142d   :  { %v1284_v51 = vpop.permute.xlu2 %1283 }
0x143a   :  { %v1281_v48 = vpop.permute.xlu1 %1280 }
0x143b   :  { %v1286_v52 = vsel %vm222_vm3, %v1281_v48, %v1284_v51  ;;  %v1532_v48 = vld [vmem:[%s2429_s14] ss:$0 sm:$0xff] }
0x143c   :  { %1509 = vmatmul.msk.f32.vlgmr.msrb.gmra.mxu0 %vm333_vm11, %v1286_v52 }
0x14b9   :  { %v1307_v38 = vpop.f32.mrf.mxu0 }
0x14ba   :  { %v1308_v54 = vadd.f32 %v2337_v11, %v1307_v38 }
0x14bc   :  { %v1510_v63 = vmul.f32 -1.442695, %v1308_v54 }
0x14be   :  { %1656 = vpow2.f32 %v1510_v63 }
0x14c4   :  { %v1657_v5 = vpop.eup %1656 }
0x14c5   :  { %v1314_v49 = vadd.f32 1.0, %v1657_v5 }
0x14c7   :  { %1658 = vrcp.f32 %v1314_v49  ;;  %v1326_v8 = vand.u32 2147483648, %v1314_v49  ;;  %v1324_v50 = vand.u32 2147483647, %v1314_v49  ;;  %vm1320_vm8 = vweird.f32 %v1314_v49 }
0x14c8   :  { %1660 = vtanh.f32 %v1308_v54 }
0x14c9   :  { %v1327_v13 = vor.u32 1.1754944e-38, %v1326_v8  ;;  %vm1325_vm11 = vcmp.eq.f32.partialorder %v1324_v50, 8.507059e+37 }
0x14cd   :  { %v1659_v53 = vpop.eup %1658 }
0x14ce   :  { %v1316_v7 = vmul.f32 %v1659_v53, %v1314_v49  ;;  %vm1321_vm6 = vweird.f32 %v1659_v53  ;;  %v1661_v11 = vpop.eup %1660  ;;  %v1533_v49 = vld [vmem:[%s2431_s16] ss:$0 sm:$0xff] }
0x14cf   :  { %vm1322_vm9 = vmor %vm1320_vm8, %vm1321_vm6 }
0x14d0   :  { %v1317_v9 = vsub.f32 1.0, %v1316_v7 }
0x14d2   :  { %v1318_v6 = vmul.f32 %v1659_v53, %v1317_v9 }
0x14d4   :  { %v1319_v1 = vadd.f32 %v1659_v53, %v1318_v6 }
0x14d6   :  { %v1323_v14 = vsel %vm1322_vm9, %v1659_v53, %v1319_v1 }
0x14d7   :  { %v1328_v55 = vsel %vm1325_vm11, %v1327_v13, %v1323_v14 }
0x14d8   :  { %v1330_v19 = vsel %vm2056_vm7, %v1661_v11, %v1328_v55 }
0x14d9   :  { %1333 = vrot.lane.b32.xlu0 %v1330_v19, %s1877_s3 }
0x14e1   :  { %396 = vrot.lane.b32.xlu0 %v2164_v4, %s1878_s6 }
0x14e9   :  { %805 = vrot.lane.b32.xlu0 %v2273_v62, %s1878_s6  ;;  %v1331_v62 = vmul.f32 %v1330_v19, %v1205_v40  ;;  %v1435_v40 = vpack.c.bf16 %v1434_v39, %v1433_v37 }
0x14eb   :  { %1450 = vmatpush.bf16.msra.mxu0 %v1435_v40 }
0x14f1   :  { %1213 = vrot.lane.b32.xlu0 %v1211_v43, %s1878_s6 }
0x154b   :  { %v1334_v56 = vpop.permute.xlu0 %1333 }
0x154c   :  { %v1336_v20 = vmul.f32 %v1334_v56, %v1330_v19 }
0x154e   :  { %1338 = vrot.lane.b32.xlu1 %v1336_v20, %s1878_s6 }
0x1553   :  { %v397_v57 = vpop.permute.xlu0 %396 }
0x1554   :  { %400 = vst.msk [vmem:[#allocation3] sm:$0x1] %vm399_vm10, %v397_v57 }
0x1556   :  { %533 = vrot.lane.b32.xlu1 %v2203_v10, %s1878_s6 }
0x155b   :  { %v806_v42 = vpop.permute.xlu0 %805 }
0x155c   :  { %808 = vst.msk [vmem:[#allocation3 + $0x3] sm:$0x1] %vm399_vm10, %v806_v42 }
0x155e   :  { %941 = vrot.lane.b32.xlu1 %v2300_v2, %s1878_s6 }
0x1563   :  { %v1214_v4 = vpop.permute.xlu0 %1213 }
0x1564   :  { %1216 = vst.msk [vmem:[#allocation3 + $0x6] sm:$0x1] %vm399_vm10, %v1214_v4 }
0x15c0   :  { %v1339_v58 = vpop.permute.xlu1 %1338 }
0x15c1   :  { %v1341_v59 = vadd.f32 %v1339_v58, %v1331_v62 }
0x15c3   :  { %1662 = vtanh.f32 %v1341_v59 }
0x15c8   :  { %v534_v3 = vpop.permute.xlu1 %533 }
0x15c9   :  { %v1663_v21 = vpop.eup %1662  ;;  %536 = vst.msk [vmem:[#allocation3 + $0x1] sm:$0x1] %vm399_vm10, %v534_v3 }
0x15ca   :  { %1344 = vrot.lane.b32.xlu2 %v1663_v21, %s1877_s3 }
0x15d0   :  { %v942_v10 = vpop.permute.xlu1 %941 }
0x15d1   :  { %944 = vst.msk [vmem:[#allocation3 + $0x4] sm:$0x1] %vm399_vm10, %v942_v10 }
0x15d2   :  { %669 = vrot.lane.b32.xlu2 %v2238_v12, %s1878_s6  ;;  %v1358_v12 = vld [vmem:[%s2424_s9 + $0x18] sm:$0xff] }
0x15d3   :  { %v1360_v23 = vpack.c.bf16 %v1358_v12, %v1357_v0 }
0x15d5   :  { %1374 = vmatpush.bf16.msrb.mxu2 %v1360_v23 }
0x15da   :  { %1077 = vrot.lane.b32.xlu2 %v2326_v44, %s1878_s6  ;;  %v1355_v44 = vld [vmem:[%s2424_s9] sm:$0xff] }
0x15db   :  { %v1359_v24 = vpack.c.bf16 %v1356_v15, %v1355_v44 }
0x15dd   :  { %1375 = vmatpush.bf16.msrb.mxu2 %v1359_v24 }
0x1624   :  { %v1345_v2 = vpop.permute.xlu2 %1344 }
0x1625   :  { %v1347_v60 = vmul.f32 %v1345_v2, %v1330_v19 }
0x1627   :  { %1349 = vrot.lane.b32.xlu1 %v1347_v60, %s1878_s6 }
0x162c   :  { %v670_v61 = vpop.permute.xlu2 %669 }
0x162d   :  { %672 = vst.msk [vmem:[#allocation3 + $0x2] sm:$0x1] %vm399_vm10, %v670_v61 }
0x1634   :  { %v1078_v22 = vpop.permute.xlu2 %1077 }
0x1635   :  { %1080 = vst.msk [vmem:[#allocation3 + $0x5] sm:$0x1] %vm399_vm10, %v1078_v22 }
0x1699   :  { %v1350_v17 = vpop.permute.xlu1 %1349 }
0x169a   :  { %1352 = vst.msk [vmem:[#allocation3 + $0x7] sm:$0x1] %vm399_vm10, %v1350_v17 }
0x16a1   :  { %v1353_v27 = vld [vmem:[#allocation3] sm:$0xff] }
0x16a2   :  { %v1354_v18 = vpack.c.bf16 %v1353_v27, %v1353_v27 }
0x16a4   :  { %1511 = vmatmul.msk.bf16.vlgmr.msrb.gmra.mxu2 %vm222_vm3, %v1354_v18 }
0x1727   :  { %v1377_v32 = vpop.f32.mrf.mxu2 }
0x1728   :  { %v1378_v33 = vadd.f32 %v1530_v31, %v1377_v32 }
0x172a   :  { %v1381_v34 = vmax.f32 %v1378_v33, 0.0 }
0x172c   :  { %v1382_v35 = vpack.c.bf16 %v1381_v34, %v1381_v34 }
0x172e   :  { %1512 = vmatmul.msk.bf16.vlgmr.msrb.gmra.mxu3 %vm168_vm0, %v1382_v35 }
0x172f   :  { %v1379_v36 = vpop.f32.mrf.mxu2 }
0x17b1   :  { %v1402_v45 = vpop.f32.mrf.mxu3 }
0x17b2   :  { %v1403_v46 = vadd.f32 %v1531_v41, %v1402_v45 }
0x17b4   :  { %v1406_v47 = vmax.f32 %v1403_v46, 0.0 }
0x17b6   :  { %v1407_v43 = vpack.c.bf16 %v1406_v47, %v1406_v47 }
0x17b8   :  { %1513 = vmatmul.msk.bf16.vlgmr.msrb.gmra.mxu1 %vm168_vm0, %v1407_v43 }
0x17b9   :  { %v1404_v51 = vpop.f32.mrf.mxu3 }
0x1835   :  { %v1427_v52 = vpop.f32.mrf.mxu1 }
0x1836   :  { %v1428_v38 = vadd.f32 %v1532_v48, %v1427_v52 }
0x1838   :  { %v1431_v54 = vmax.f32 %v1428_v38, 0.0 }
0x183a   :  { %v1432_v63 = vpack.c.bf16 %v1431_v54, %v1431_v54 }
0x183c   :  { %1514 = vmatmul.msk.bf16.vlgmr.msra.gmra.mxu0 %vm168_vm0, %v1432_v63 }
0x183d   :  { %v1429_v5 = vpop.f32.mrf.mxu1 }
0x18b9   :  { %v1452_v53 = vpop.f32.mrf.mxu0 }
0x18ba   :  { %v1453_v7 = vadd.f32 %v1533_v49, %v1452_v53 }
0x18bc   :  { %1456 = vst [vmem:[#allocation16] sm:$0xff] %v1453_v7 }
0x18bd   :  { %1467 = dma.vmem_to_hbm [thread:$0]  %s1463_s21, 128, %s1465_s26, [#allocation6]  }
0x18c1   :  { %v1454_v9 = vpop.f32.mrf.mxu0 }
0x18c2   :  { %1865 = dma.done.wait [#allocation6], 128  }
0x18c3   :  { %1866 = vsyncadd [#allocation6], 4294967168 }
0x18c4   :  { %1472 = vsyncpa [#allocation5], 1 }
0x18c5   :  { %1473 = vsyncpa [#allocation8], 1 }
0x18c6   :  { %1474 = vsyncpa [#allocation11], 1 }
0x18c7   :  { %1475 = vsyncpa [#allocation14], 1 }
0x18c8   :  { %1476 = vsyncpa [#allocation6], 1 }

</bundles_post_ra>
